<compile_context>
chip_gen: v7x
topology: tpu7x:2x2x1
jax: 0.10.0
libtpu: 0.0.40
codegen_flags: <defaults>
</compile_context>

<pallas_src>
import functools

import jax
import jax.numpy as jnp
from jax.experimental import pallas as pl
from jax.experimental.pallas import tpu as pltpu


# -----------------------------------------------------------------------------
# Single fused kernel: whole MG.forward (4 encoder passes + 2 masked SCE losses)
# -----------------------------------------------------------------------------
def _make_mg_kernel(n1, n2, inv_m0, inv_m1, alpha, mxu_dtype):
    """Build the fused forward kernel.  n1/n2/num_mask/alpha are static."""

    def kernel(*refs):
        # ---- unpack refs (order must match the pallas_call argument order) ----
        (a_norm_ref, a_diff_ref, attr_ref, keep0_ref, keep1_ref,
         enc_bgb_ref, dec_bgb_ref, p_enc_ref, p_dec_ref) = refs[:9]
        enc_w_refs = refs[9:9 + n1]
        dec_w_refs = refs[9 + n1:9 + n1 + n2]
        out_ref = refs[9 + n1 + n2]

        a_norm = a_norm_ref[...].astype(mxu_dtype)
        a_diff = a_diff_ref[...].astype(mxu_dtype)
        attr = attr_ref[...]
        keep0 = keep0_ref[...]          # (N, 1), 1 = keep, 0 = masked
        keep1 = keep1_ref[...]

        def run_encoder(a, x, w_refs, bgb_ref, p_ref, n_layers):
            """GraphConv(+bias+PReLU) -> BatchNorm -> PReLU, unrolled over layers.

            bgb_ref rows: layer i -> [3i] bias, [3i+1] gamma, [3i+2] beta.
            p_ref (SMEM): layer i -> [2i] conv-PReLU slope, [2i+1] outer-PReLU slope.
            """
            h = x
            for i in range(n_layers):
                w = w_refs[i][...]
                fin, fout = w_refs[i].shape
                # GraphConv: A_hat @ X @ W  — associate by static shape (cheapest order).
                if fin > fout:
                    xw = jnp.dot(h.astype(mxu_dtype), w.astype(mxu_dtype),
                                 preferred_element_type=jnp.float32)
                    z = jnp.dot(a, xw.astype(mxu_dtype),
                                preferred_element_type=jnp.float32)
                else:
                    ax = jnp.dot(a, h.astype(mxu_dtype),
                                 preferred_element_type=jnp.float32)
                    z = jnp.dot(ax.astype(mxu_dtype), w.astype(mxu_dtype),
                                preferred_element_type=jnp.float32)
                z = z + bgb_ref[3 * i:3 * i + 1, :]               # bias

                # GraphConv activation: PReLU (single learnable slope)
                s1 = p_ref[2 * i]
                z = jnp.where(z > 0, z, s1 * z)

                # BatchNorm1d over nodes, training-mode batch stats (eps = 1e-5),
                # single pass: var = E[z^2] - mean^2.
                n_rows = z.shape[0]
                inv_n = 1.0 / n_rows
                s = jnp.sum(z, axis=0, keepdims=True) * inv_n         # mean
                ss = jnp.sum(z * z, axis=0, keepdims=True) * inv_n    # E[z^2]
                var = ss - s * s
                z = ((z - s) * jax.lax.rsqrt(var + 1e-5)
                     * bgb_ref[3 * i + 1:3 * i + 2, :]                # gamma
                     + bgb_ref[3 * i + 2:3 * i + 3, :])               # beta

                # Outer PReLU (self.actions[i])
                s2 = p_ref[2 * i + 1]
                z = jnp.where(z > 0, z, s2 * z)
                h = z
            return h
            # NOTE: the SumPooling output gh of the reference module is never used in
            # MG.forward, so it is intentionally not computed here.

        def masked_sce(h1, h2, keep, inv_m):
            """mean over masked nodes of (1 - cos(h1, h2)), alpha=1.

            F.normalize(p=2) clamp max(||v||, 1e-12) == rsqrt(max(ss, 1e-24)).
            """
            w = 1.0 - keep                                           # (N, 1): 1 on masked
            ssx = jnp.sum(h1 * h1, axis=-1, keepdims=True)
            ssy = jnp.sum(h2 * h2, axis=-1, keepdims=True)
            xy = jnp.sum(h1 * h2, axis=-1, keepdims=True)
            cos = (xy * jax.lax.rsqrt(jnp.maximum(ssx, 1e-24))
                   * jax.lax.rsqrt(jnp.maximum(ssy, 1e-24)))
            return jnp.sum(w * (1.0 - cos), axis=0, keepdims=True) * inv_m   # (1, 1)

        # --- pass 1: enc(masked attr) vs dec(attr), loss over mask_nodes (rate) ---
        h1 = run_encoder(a_norm, attr * keep0, enc_w_refs, enc_bgb_ref, p_enc_ref, n1)
        h2 = run_encoder(a_diff, attr, dec_w_refs, dec_bgb_ref, p_dec_ref, n2)
        loss1 = masked_sce(h1, h2, keep0, inv_m0)

        # --- pass 2: enc(attr) vs dec(masked attr), loss over mask_nodes1 (rate1) ---
        h1b = run_encoder(a_norm, attr, enc_w_refs, enc_bgb_ref, p_enc_ref, n1)
        h2b = run_encoder(a_diff, attr * keep1, dec_w_refs, dec_bgb_ref, p_dec_ref, n2)
        loss2 = masked_sce(h1b, h2b, keep1, inv_m1)

        out_ref[...] = alpha * loss1 + (1.0 - alpha) * loss2

    return kernel


# -----------------------------------------------------------------------------
# Host wrapper: parameter packing, node masking (randperm -> float keep mask),
# and the single pallas_call.
# -----------------------------------------------------------------------------
def _pack_encoder_params(params):
    """-> (bgb [3n, F], slopes [2n] for SMEM, list of weight matrices)."""
    bgb = jnp.concatenate(
        [jnp.stack([p["b"], p["gamma"], p["beta"]], axis=0) for p in params], axis=0)
    slopes = jnp.stack([v for p in params for v in (p["p_conv"], p["p_bn"])])
    ws = [p["w"] for p in params]
    return bgb, slopes, ws


def mg_forward(attr, a_norm, a_diff, enc_params, dec_params,
               rate, rate1, alpha, key, mxu_dtype=jnp.float32):
    # On v6e/v7x, mxu_dtype=jnp.bfloat16 halves MXU operand bytes once N/F scale;
    # keep f32 (default) on v5e and for exact parity with the f32 reference.
    n_nodes, _ = attr.shape
    n1, n2 = len(enc_params), len(dec_params)
    k1, k2 = jax.random.split(key)

    # mask(graph, rate): torch.randperm -> first rate*N nodes, expressed as float keep-mask.
    num_mask0 = int(rate * n_nodes)
    num_mask1 = int(rate1 * n_nodes)
    mask_nodes0 = jax.random.permutation(k1, n_nodes)[:num_mask0]
    mask_nodes1 = jax.random.permutation(k2, n_nodes)[:num_mask1]
    keep0 = jnp.ones((n_nodes, 1), jnp.float32).at[mask_nodes0].set(0.0)
    keep1 = jnp.ones((n_nodes, 1), jnp.float32).at[mask_nodes1].set(0.0)

    enc_bgb, enc_p, enc_ws = _pack_encoder_params(enc_params)
    dec_bgb, dec_p, dec_ws = _pack_encoder_params(dec_params)

    kernel = _make_mg_kernel(n1, n2, 1.0 / num_mask0, 1.0 / num_mask1,
                             float(alpha), mxu_dtype)

    vmem = pl.BlockSpec(memory_space=pltpu.MemorySpace.VMEM)
    smem = pl.BlockSpec(memory_space=pltpu.MemorySpace.SMEM)
    in_specs = [vmem] * 7 + [smem, smem] + [vmem] * (n1 + n2)

    # TODO(synk): at larger N, add a "parallel" grid axis over the 4 independent encoder
    # passes (plus a small cross-pass loss reduction) so v7x's second TensorCore is used,
    # and tile A into (128, N) row blocks with an explicit vmem_limit_bytes budget.
    out = pl.pallas_call(
        kernel,
        out_shape=jax.ShapeDtypeStruct((1, 1), jnp.float32),
        in_specs=in_specs,
        out_specs=vmem,
    )(a_norm, a_diff, attr, keep0, keep1,
      enc_bgb, dec_bgb, enc_p, dec_p, *enc_ws, *dec_ws)
    return out[0, 0]


# -----------------------------------------------------------------------------
# Parameter init (matches torch defaults: PReLU slope 0.25, BN gamma=1/beta=0)
# -----------------------------------------------------------------------------
def init_encoder(key, in_hidden, out_hidden, n):
    layers = []
    for i in range(n):
        key, k = jax.random.split(key)
        fin = in_hidden if i == 0 else out_hidden
        layers.append(dict(
            w=(jax.random.normal(k, (fin, out_hidden), jnp.float32)
               / jnp.sqrt(jnp.float32(fin))),
            b=jnp.zeros((out_hidden,), jnp.float32),
            gamma=jnp.ones((out_hidden,), jnp.float32),
            beta=jnp.zeros((out_hidden,), jnp.float32),
            p_conv=jnp.array(0.25, jnp.float32),
            p_bn=jnp.array(0.25, jnp.float32),
        ))
    return layers


# -----------------------------------------------------------------------------
# main
# -----------------------------------------------------------------------------
if __name__ == "__main__":
    # Small synthetic problem consistent with the module:
    #   N = 16 nodes, in_hidden = 32, out_hidden = 32, n1 = n2 = 2
    N, IN_H, OUT_H = 16, 32, 32
    RATE, RATE1, ALPHA = 0.5, 0.25, 0.6
    N1, N2 = 2, 2

    root = jax.random.PRNGKey(0)
    k_attr, k_adj, k_dw, k_dm, k_enc, k_dec, k_mask = jax.random.split(root, 7)

    # node features (graph.ndata['attr'])
    attr = jax.random.normal(k_attr, (N, IN_H), jnp.float32)

    # graph: random symmetric binary adjacency, no self loops; GraphConv norm='both'
    b = jax.random.bernoulli(k_adj, 0.3, (N, N)).astype(jnp.float32)
    adj = jnp.maximum(b, b.T) * (1.0 - jnp.eye(N, dtype=jnp.float32))
    deg = jnp.clip(jnp.sum(adj, axis=1), 1.0, None)
    dinv = jax.lax.rsqrt(deg)
    a_norm = dinv[:, None] * adj * dinv[None, :]          # D^-1/2 A D^-1/2

    # diff_graph: weighted adjacency (diff_weight), GraphConv norm='none'
    # (independent keys for the weights and the sparsity mask)
    a_diff = (jax.random.uniform(k_dw, (N, N), jnp.float32)
              * jax.random.bernoulli(k_dm, 0.5, (N, N)).astype(jnp.float32))

    enc_params = init_encoder(k_enc, IN_H, OUT_H, N1)     # Encoder1
    dec_params = init_encoder(k_dec, IN_H, OUT_H, N2)     # Encoder2

    loss = mg_forward(attr, a_norm, a_diff, enc_params, dec_params,
                      RATE, RATE1, ALPHA, k_mask)
    loss = jax.block_until_ready(loss)
    assert jnp.isfinite(loss)
    print("KERNEL_OK")
</pallas_src>

<mosaic_0001>
module attributes {stable_mosaic.version = 11 : i64} {
  func.func @kernel(%arg0: memref<16x16xf32, #tpu.memory_space<vmem>>, %arg1: memref<16x16xf32, #tpu.memory_space<vmem>>, %arg2: memref<16x32xf32, #tpu.memory_space<vmem>>, %arg3: memref<16x1xf32, #tpu.memory_space<vmem>>, %arg4: memref<16x1xf32, #tpu.memory_space<vmem>>, %arg5: memref<6x32xf32, #tpu.memory_space<vmem>>, %arg6: memref<6x32xf32, #tpu.memory_space<vmem>>, %arg7: memref<4xf32, #tpu.memory_space<smem>>, %arg8: memref<4xf32, #tpu.memory_space<smem>>, %arg9: memref<32x32xf32, #tpu.memory_space<vmem>>, %arg10: memref<32x32xf32, #tpu.memory_space<vmem>>, %arg11: memref<32x32xf32, #tpu.memory_space<vmem>>, %arg12: memref<32x32xf32, #tpu.memory_space<vmem>>, %arg13: memref<1x1xf32, #tpu.memory_space<vmem>>) attributes {dimension_semantics = [], scalar_prefetch = 0 : i64, scratch_operands = 0 : i64, tpu.core_type = #tpu.core_type<tc>} {
    %c0 = arith.constant 0 : index
    %c0_0 = arith.constant 0 : index
    %0 = vector.load %arg0[%c0, %c0_0] : memref<16x16xf32, #tpu.memory_space<vmem>>, vector<16x16xf32>
    %c0_1 = arith.constant 0 : index
    %c0_2 = arith.constant 0 : index
    %1 = vector.load %arg1[%c0_1, %c0_2] : memref<16x16xf32, #tpu.memory_space<vmem>>, vector<16x16xf32>
    %c0_3 = arith.constant 0 : index
    %c0_4 = arith.constant 0 : index
    %2 = vector.load %arg2[%c0_3, %c0_4] : memref<16x32xf32, #tpu.memory_space<vmem>>, vector<16x32xf32>
    %c0_5 = arith.constant 0 : index
    %c0_6 = arith.constant 0 : index
    %3 = vector.load %arg3[%c0_5, %c0_6] : memref<16x1xf32, #tpu.memory_space<vmem>>, vector<16x1xf32>
    %c0_7 = arith.constant 0 : index
    %c0_8 = arith.constant 0 : index
    %4 = vector.load %arg4[%c0_7, %c0_8] : memref<16x1xf32, #tpu.memory_space<vmem>>, vector<16x1xf32>
    %5 = vector.broadcast %3 : vector<16x1xf32> to vector<16x32xf32>
    %6 = arith.mulf %2, %5 : vector<16x32xf32>
    %c0_9 = arith.constant 0 : index
    %c0_10 = arith.constant 0 : index
    %7 = vector.load %arg9[%c0_9, %c0_10] : memref<32x32xf32, #tpu.memory_space<vmem>>, vector<32x32xf32>
    %cst = arith.constant dense<0.000000e+00> : vector<16x32xf32>
    %8 = tpu.matmul %0, %6, %cst {dimension_numbers = #tpu.dot_dimension_numbers<[1], [0], [0], [1], [0, 0, 1, 1], [], []>} : vector<16x16xf32>, vector<16x32xf32>, vector<16x32xf32> -> vector<16x32xf32>
    %cst_11 = arith.constant dense<0.000000e+00> : vector<16x32xf32>
    %9 = tpu.matmul %8, %7, %cst_11 {dimension_numbers = #tpu.dot_dimension_numbers<[1], [0], [0], [1], [0, 0, 1, 1], [], []>} : vector<16x32xf32>, vector<32x32xf32>, vector<16x32xf32> -> vector<16x32xf32>
    %c0_12 = arith.constant 0 : index
    %c0_13 = arith.constant 0 : index
    %10 = vector.load %arg5[%c0_12, %c0_13] : memref<6x32xf32, #tpu.memory_space<vmem>>, vector<1x32xf32>
    %11 = vector.broadcast %10 : vector<1x32xf32> to vector<16x32xf32>
    %12 = arith.addf %9, %11 : vector<16x32xf32>
    %c0_14 = arith.constant 0 : index
    %13 = memref.load %arg7[%c0_14] : memref<4xf32, #tpu.memory_space<smem>>
    %cst_15 = arith.constant 0.000000e+00 : f32
    %14 = vector.broadcast %cst_15 : f32 to vector<16x32xf32>
    %15 = arith.cmpf ogt, %12, %14 : vector<16x32xf32>
    %16 = vector.broadcast %13 : f32 to vector<16x32xf32>
    %17 = arith.mulf %16, %12 : vector<16x32xf32>
    %18 = arith.select %15, %12, %17 : vector<16x32xi1>, vector<16x32xf32>
    %cst_16 = arith.constant dense<0.000000e+00> : vector<32xf32>
    %19 = vector.multi_reduction <add>, %18, %cst_16 [0] : vector<16x32xf32> to vector<32xf32>
    %20 = vector.shape_cast %19 : vector<32xf32> to vector<1x32xf32>
    %cst_17 = arith.constant 6.250000e-02 : f32
    %21 = vector.broadcast %cst_17 : f32 to vector<1x32xf32>
    %22 = arith.mulf %20, %21 : vector<1x32xf32>
    %23 = arith.mulf %18, %18 : vector<16x32xf32>
    %cst_18 = arith.constant dense<0.000000e+00> : vector<32xf32>
    %24 = vector.multi_reduction <add>, %23, %cst_18 [0] : vector<16x32xf32> to vector<32xf32>
    %25 = vector.shape_cast %24 : vector<32xf32> to vector<1x32xf32>
    %cst_19 = arith.constant 6.250000e-02 : f32
    %26 = vector.broadcast %cst_19 : f32 to vector<1x32xf32>
    %27 = arith.mulf %25, %26 : vector<1x32xf32>
    %28 = arith.mulf %22, %22 : vector<1x32xf32>
    %29 = arith.subf %27, %28 : vector<1x32xf32>
    %30 = vector.broadcast %22 : vector<1x32xf32> to vector<16x32xf32>
    %31 = arith.subf %18, %30 : vector<16x32xf32>
    %cst_20 = arith.constant 9.99999974E-6 : f32
    %32 = vector.broadcast %cst_20 : f32 to vector<1x32xf32>
    %33 = arith.addf %29, %32 : vector<1x32xf32>
    %34 = math.rsqrt %33 : vector<1x32xf32>
    %35 = vector.broadcast %34 : vector<1x32xf32> to vector<16x32xf32>
    %36 = arith.mulf %31, %35 : vector<16x32xf32>
    %c1 = arith.constant 1 : index
    %c0_21 = arith.constant 0 : index
    %37 = vector.load %arg5[%c1, %c0_21] : memref<6x32xf32, #tpu.memory_space<vmem>>, vector<1x32xf32>
    %38 = vector.broadcast %37 : vector<1x32xf32> to vector<16x32xf32>
    %39 = arith.mulf %36, %38 : vector<16x32xf32>
    %c2 = arith.constant 2 : index
    %c0_22 = arith.constant 0 : index
    %40 = vector.load %arg5[%c2, %c0_22] : memref<6x32xf32, #tpu.memory_space<vmem>>, vector<1x32xf32>
    %41 = vector.broadcast %40 : vector<1x32xf32> to vector<16x32xf32>
    %42 = arith.addf %39, %41 : vector<16x32xf32>
    %c1_23 = arith.constant 1 : index
    %43 = memref.load %arg7[%c1_23] : memref<4xf32, #tpu.memory_space<smem>>
    %cst_24 = arith.constant 0.000000e+00 : f32
    %44 = vector.broadcast %cst_24 : f32 to vector<16x32xf32>
    %45 = arith.cmpf ogt, %42, %44 : vector<16x32xf32>
    %46 = vector.broadcast %43 : f32 to vector<16x32xf32>
    %47 = arith.mulf %46, %42 : vector<16x32xf32>
    %48 = arith.select %45, %42, %47 : vector<16x32xi1>, vector<16x32xf32>
    %c0_25 = arith.constant 0 : index
    %c0_26 = arith.constant 0 : index
    %49 = vector.load %arg10[%c0_25, %c0_26] : memref<32x32xf32, #tpu.memory_space<vmem>>, vector<32x32xf32>
    %cst_27 = arith.constant dense<0.000000e+00> : vector<16x32xf32>
    %50 = tpu.matmul %0, %48, %cst_27 {dimension_numbers = #tpu.dot_dimension_numbers<[1], [0], [0], [1], [0, 0, 1, 1], [], []>} : vector<16x16xf32>, vector<16x32xf32>, vector<16x32xf32> -> vector<16x32xf32>
    %cst_28 = arith.constant dense<0.000000e+00> : vector<16x32xf32>
    %51 = tpu.matmul %50, %49, %cst_28 {dimension_numbers = #tpu.dot_dimension_numbers<[1], [0], [0], [1], [0, 0, 1, 1], [], []>} : vector<16x32xf32>, vector<32x32xf32>, vector<16x32xf32> -> vector<16x32xf32>
    %c3 = arith.constant 3 : index
    %c0_29 = arith.constant 0 : index
    %52 = vector.load %arg5[%c3, %c0_29] : memref<6x32xf32, #tpu.memory_space<vmem>>, vector<1x32xf32>
    %53 = vector.broadcast %52 : vector<1x32xf32> to vector<16x32xf32>
    %54 = arith.addf %51, %53 : vector<16x32xf32>
    %c2_30 = arith.constant 2 : index
    %55 = memref.load %arg7[%c2_30] : memref<4xf32, #tpu.memory_space<smem>>
    %cst_31 = arith.constant 0.000000e+00 : f32
    %56 = vector.broadcast %cst_31 : f32 to vector<16x32xf32>
    %57 = arith.cmpf ogt, %54, %56 : vector<16x32xf32>
    %58 = vector.broadcast %55 : f32 to vector<16x32xf32>
    %59 = arith.mulf %58, %54 : vector<16x32xf32>
    %60 = arith.select %57, %54, %59 : vector<16x32xi1>, vector<16x32xf32>
    %cst_32 = arith.constant dense<0.000000e+00> : vector<32xf32>
    %61 = vector.multi_reduction <add>, %60, %cst_32 [0] : vector<16x32xf32> to vector<32xf32>
    %62 = vector.shape_cast %61 : vector<32xf32> to vector<1x32xf32>
    %cst_33 = arith.constant 6.250000e-02 : f32
    %63 = vector.broadcast %cst_33 : f32 to vector<1x32xf32>
    %64 = arith.mulf %62, %63 : vector<1x32xf32>
    %65 = arith.mulf %60, %60 : vector<16x32xf32>
    %cst_34 = arith.constant dense<0.000000e+00> : vector<32xf32>
    %66 = vector.multi_reduction <add>, %65, %cst_34 [0] : vector<16x32xf32> to vector<32xf32>
    %67 = vector.shape_cast %66 : vector<32xf32> to vector<1x32xf32>
    %cst_35 = arith.constant 6.250000e-02 : f32
    %68 = vector.broadcast %cst_35 : f32 to vector<1x32xf32>
    %69 = arith.mulf %67, %68 : vector<1x32xf32>
    %70 = arith.mulf %64, %64 : vector<1x32xf32>
    %71 = arith.subf %69, %70 : vector<1x32xf32>
    %72 = vector.broadcast %64 : vector<1x32xf32> to vector<16x32xf32>
    %73 = arith.subf %60, %72 : vector<16x32xf32>
    %cst_36 = arith.constant 9.99999974E-6 : f32
    %74 = vector.broadcast %cst_36 : f32 to vector<1x32xf32>
    %75 = arith.addf %71, %74 : vector<1x32xf32>
    %76 = math.rsqrt %75 : vector<1x32xf32>
    %77 = vector.broadcast %76 : vector<1x32xf32> to vector<16x32xf32>
    %78 = arith.mulf %73, %77 : vector<16x32xf32>
    %c4 = arith.constant 4 : index
    %c0_37 = arith.constant 0 : index
    %79 = vector.load %arg5[%c4, %c0_37] : memref<6x32xf32, #tpu.memory_space<vmem>>, vector<1x32xf32>
    %80 = vector.broadcast %79 : vector<1x32xf32> to vector<16x32xf32>
    %81 = arith.mulf %78, %80 : vector<16x32xf32>
    %c5 = arith.constant 5 : index
    %c0_38 = arith.constant 0 : index
    %82 = vector.load %arg5[%c5, %c0_38] : memref<6x32xf32, #tpu.memory_space<vmem>>, vector<1x32xf32>
    %83 = vector.broadcast %82 : vector<1x32xf32> to vector<16x32xf32>
    %84 = arith.addf %81, %83 : vector<16x32xf32>
    %c3_39 = arith.constant 3 : index
    %85 = memref.load %arg7[%c3_39] : memref<4xf32, #tpu.memory_space<smem>>
    %cst_40 = arith.constant 0.000000e+00 : f32
    %86 = vector.broadcast %cst_40 : f32 to vector<16x32xf32>
    %87 = arith.cmpf ogt, %84, %86 : vector<16x32xf32>
    %88 = vector.broadcast %85 : f32 to vector<16x32xf32>
    %89 = arith.mulf %88, %84 : vector<16x32xf32>
    %90 = arith.select %87, %84, %89 : vector<16x32xi1>, vector<16x32xf32>
    %c0_41 = arith.constant 0 : index
    %c0_42 = arith.constant 0 : index
    %91 = vector.load %arg11[%c0_41, %c0_42] : memref<32x32xf32, #tpu.memory_space<vmem>>, vector<32x32xf32>
    %cst_43 = arith.constant dense<0.000000e+00> : vector<16x32xf32>
    %92 = tpu.matmul %1, %2, %cst_43 {dimension_numbers = #tpu.dot_dimension_numbers<[1], [0], [0], [1], [0, 0, 1, 1], [], []>} : vector<16x16xf32>, vector<16x32xf32>, vector<16x32xf32> -> vector<16x32xf32>
    %cst_44 = arith.constant dense<0.000000e+00> : vector<16x32xf32>
    %93 = tpu.matmul %92, %91, %cst_44 {dimension_numbers = #tpu.dot_dimension_numbers<[1], [0], [0], [1], [0, 0, 1, 1], [], []>} : vector<16x32xf32>, vector<32x32xf32>, vector<16x32xf32> -> vector<16x32xf32>
    %c0_45 = arith.constant 0 : index
    %c0_46 = arith.constant 0 : index
    %94 = vector.load %arg6[%c0_45, %c0_46] : memref<6x32xf32, #tpu.memory_space<vmem>>, vector<1x32xf32>
    %95 = vector.broadcast %94 : vector<1x32xf32> to vector<16x32xf32>
    %96 = arith.addf %93, %95 : vector<16x32xf32>
    %c0_47 = arith.constant 0 : index
    %97 = memref.load %arg8[%c0_47] : memref<4xf32, #tpu.memory_space<smem>>
    %cst_48 = arith.constant 0.000000e+00 : f32
    %98 = vector.broadcast %cst_48 : f32 to vector<16x32xf32>
    %99 = arith.cmpf ogt, %96, %98 : vector<16x32xf32>
    %100 = vector.broadcast %97 : f32 to vector<16x32xf32>
    %101 = arith.mulf %100, %96 : vector<16x32xf32>
    %102 = arith.select %99, %96, %101 : vector<16x32xi1>, vector<16x32xf32>
    %cst_49 = arith.constant dense<0.000000e+00> : vector<32xf32>
    %103 = vector.multi_reduction <add>, %102, %cst_49 [0] : vector<16x32xf32> to vector<32xf32>
    %104 = vector.shape_cast %103 : vector<32xf32> to vector<1x32xf32>
    %cst_50 = arith.constant 6.250000e-02 : f32
    %105 = vector.broadcast %cst_50 : f32 to vector<1x32xf32>
    %106 = arith.mulf %104, %105 : vector<1x32xf32>
    %107 = arith.mulf %102, %102 : vector<16x32xf32>
    %cst_51 = arith.constant dense<0.000000e+00> : vector<32xf32>
    %108 = vector.multi_reduction <add>, %107, %cst_51 [0] : vector<16x32xf32> to vector<32xf32>
    %109 = vector.shape_cast %108 : vector<32xf32> to vector<1x32xf32>
    %cst_52 = arith.constant 6.250000e-02 : f32
    %110 = vector.broadcast %cst_52 : f32 to vector<1x32xf32>
    %111 = arith.mulf %109, %110 : vector<1x32xf32>
    %112 = arith.mulf %106, %106 : vector<1x32xf32>
    %113 = arith.subf %111, %112 : vector<1x32xf32>
    %114 = vector.broadcast %106 : vector<1x32xf32> to vector<16x32xf32>
    %115 = arith.subf %102, %114 : vector<16x32xf32>
    %cst_53 = arith.constant 9.99999974E-6 : f32
    %116 = vector.broadcast %cst_53 : f32 to vector<1x32xf32>
    %117 = arith.addf %113, %116 : vector<1x32xf32>
    %118 = math.rsqrt %117 : vector<1x32xf32>
    %119 = vector.broadcast %118 : vector<1x32xf32> to vector<16x32xf32>
    %120 = arith.mulf %115, %119 : vector<16x32xf32>
    %c1_54 = arith.constant 1 : index
    %c0_55 = arith.constant 0 : index
    %121 = vector.load %arg6[%c1_54, %c0_55] : memref<6x32xf32, #tpu.memory_space<vmem>>, vector<1x32xf32>
    %122 = vector.broadcast %121 : vector<1x32xf32> to vector<16x32xf32>
    %123 = arith.mulf %120, %122 : vector<16x32xf32>
    %c2_56 = arith.constant 2 : index
    %c0_57 = arith.constant 0 : index
    %124 = vector.load %arg6[%c2_56, %c0_57] : memref<6x32xf32, #tpu.memory_space<vmem>>, vector<1x32xf32>
    %125 = vector.broadcast %124 : vector<1x32xf32> to vector<16x32xf32>
    %126 = arith.addf %123, %125 : vector<16x32xf32>
    %c1_58 = arith.constant 1 : index
    %127 = memref.load %arg8[%c1_58] : memref<4xf32, #tpu.memory_space<smem>>
    %cst_59 = arith.constant 0.000000e+00 : f32
    %128 = vector.broadcast %cst_59 : f32 to vector<16x32xf32>
    %129 = arith.cmpf ogt, %126, %128 : vector<16x32xf32>
    %130 = vector.broadcast %127 : f32 to vector<16x32xf32>
    %131 = arith.mulf %130, %126 : vector<16x32xf32>
    %132 = arith.select %129, %126, %131 : vector<16x32xi1>, vector<16x32xf32>
    %c0_60 = arith.constant 0 : index
    %c0_61 = arith.constant 0 : index
    %133 = vector.load %arg12[%c0_60, %c0_61] : memref<32x32xf32, #tpu.memory_space<vmem>>, vector<32x32xf32>
    %cst_62 = arith.constant dense<0.000000e+00> : vector<16x32xf32>
    %134 = tpu.matmul %1, %132, %cst_62 {dimension_numbers = #tpu.dot_dimension_numbers<[1], [0], [0], [1], [0, 0, 1, 1], [], []>} : vector<16x16xf32>, vector<16x32xf32>, vector<16x32xf32> -> vector<16x32xf32>
    %cst_63 = arith.constant dense<0.000000e+00> : vector<16x32xf32>
    %135 = tpu.matmul %134, %133, %cst_63 {dimension_numbers = #tpu.dot_dimension_numbers<[1], [0], [0], [1], [0, 0, 1, 1], [], []>} : vector<16x32xf32>, vector<32x32xf32>, vector<16x32xf32> -> vector<16x32xf32>
    %c3_64 = arith.constant 3 : index
    %c0_65 = arith.constant 0 : index
    %136 = vector.load %arg6[%c3_64, %c0_65] : memref<6x32xf32, #tpu.memory_space<vmem>>, vector<1x32xf32>
    %137 = vector.broadcast %136 : vector<1x32xf32> to vector<16x32xf32>
    %138 = arith.addf %135, %137 : vector<16x32xf32>
    %c2_66 = arith.constant 2 : index
    %139 = memref.load %arg8[%c2_66] : memref<4xf32, #tpu.memory_space<smem>>
    %cst_67 = arith.constant 0.000000e+00 : f32
    %140 = vector.broadcast %cst_67 : f32 to vector<16x32xf32>
    %141 = arith.cmpf ogt, %138, %140 : vector<16x32xf32>
    %142 = vector.broadcast %139 : f32 to vector<16x32xf32>
    %143 = arith.mulf %142, %138 : vector<16x32xf32>
    %144 = arith.select %141, %138, %143 : vector<16x32xi1>, vector<16x32xf32>
    %cst_68 = arith.constant dense<0.000000e+00> : vector<32xf32>
    %145 = vector.multi_reduction <add>, %144, %cst_68 [0] : vector<16x32xf32> to vector<32xf32>
    %146 = vector.shape_cast %145 : vector<32xf32> to vector<1x32xf32>
    %cst_69 = arith.constant 6.250000e-02 : f32
    %147 = vector.broadcast %cst_69 : f32 to vector<1x32xf32>
    %148 = arith.mulf %146, %147 : vector<1x32xf32>
    %149 = arith.mulf %144, %144 : vector<16x32xf32>
    %cst_70 = arith.constant dense<0.000000e+00> : vector<32xf32>
    %150 = vector.multi_reduction <add>, %149, %cst_70 [0] : vector<16x32xf32> to vector<32xf32>
    %151 = vector.shape_cast %150 : vector<32xf32> to vector<1x32xf32>
    %cst_71 = arith.constant 6.250000e-02 : f32
    %152 = vector.broadcast %cst_71 : f32 to vector<1x32xf32>
    %153 = arith.mulf %151, %152 : vector<1x32xf32>
    %154 = arith.mulf %148, %148 : vector<1x32xf32>
    %155 = arith.subf %153, %154 : vector<1x32xf32>
    %156 = vector.broadcast %148 : vector<1x32xf32> to vector<16x32xf32>
    %157 = arith.subf %144, %156 : vector<16x32xf32>
    %cst_72 = arith.constant 9.99999974E-6 : f32
    %158 = vector.broadcast %cst_72 : f32 to vector<1x32xf32>
    %159 = arith.addf %155, %158 : vector<1x32xf32>
    %160 = math.rsqrt %159 : vector<1x32xf32>
    %161 = vector.broadcast %160 : vector<1x32xf32> to vector<16x32xf32>
    %162 = arith.mulf %157, %161 : vector<16x32xf32>
    %c4_73 = arith.constant 4 : index
    %c0_74 = arith.constant 0 : index
    %163 = vector.load %arg6[%c4_73, %c0_74] : memref<6x32xf32, #tpu.memory_space<vmem>>, vector<1x32xf32>
    %164 = vector.broadcast %163 : vector<1x32xf32> to vector<16x32xf32>
    %165 = arith.mulf %162, %164 : vector<16x32xf32>
    %c5_75 = arith.constant 5 : index
    %c0_76 = arith.constant 0 : index
    %166 = vector.load %arg6[%c5_75, %c0_76] : memref<6x32xf32, #tpu.memory_space<vmem>>, vector<1x32xf32>
    %167 = vector.broadcast %166 : vector<1x32xf32> to vector<16x32xf32>
    %168 = arith.addf %165, %167 : vector<16x32xf32>
    %c3_77 = arith.constant 3 : index
    %169 = memref.load %arg8[%c3_77] : memref<4xf32, #tpu.memory_space<smem>>
    %cst_78 = arith.constant 0.000000e+00 : f32
    %170 = vector.broadcast %cst_78 : f32 to vector<16x32xf32>
    %171 = arith.cmpf ogt, %168, %170 : vector<16x32xf32>
    %172 = vector.broadcast %169 : f32 to vector<16x32xf32>
    %173 = arith.mulf %172, %168 : vector<16x32xf32>
    %174 = arith.select %171, %168, %173 : vector<16x32xi1>, vector<16x32xf32>
    %cst_79 = arith.constant 1.000000e+00 : f32
    %175 = vector.broadcast %cst_79 : f32 to vector<16x1xf32>
    %176 = arith.subf %175, %3 : vector<16x1xf32>
    %177 = arith.mulf %90, %90 : vector<16x32xf32>
    %cst_80 = arith.constant dense<0.000000e+00> : vector<16xf32>
    %178 = vector.multi_reduction <add>, %177, %cst_80 [1] : vector<16x32xf32> to vector<16xf32>
    %179 = vector.shape_cast %178 : vector<16xf32> to vector<16x1xf32>
    %180 = arith.mulf %174, %174 : vector<16x32xf32>
    %cst_81 = arith.constant dense<0.000000e+00> : vector<16xf32>
    %181 = vector.multi_reduction <add>, %180, %cst_81 [1] : vector<16x32xf32> to vector<16xf32>
    %182 = vector.shape_cast %181 : vector<16xf32> to vector<16x1xf32>
    %183 = arith.mulf %90, %174 : vector<16x32xf32>
    %cst_82 = arith.constant dense<0.000000e+00> : vector<16xf32>
    %184 = vector.multi_reduction <add>, %183, %cst_82 [1] : vector<16x32xf32> to vector<16xf32>
    %185 = vector.shape_cast %184 : vector<16xf32> to vector<16x1xf32>
    %cst_83 = arith.constant 1.000000e-24 : f32
    %186 = vector.broadcast %cst_83 : f32 to vector<16x1xf32>
    %187 = arith.maximumf %179, %186 : vector<16x1xf32>
    %188 = math.rsqrt %187 : vector<16x1xf32>
    %189 = arith.mulf %185, %188 : vector<16x1xf32>
    %cst_84 = arith.constant 1.000000e-24 : f32
    %190 = vector.broadcast %cst_84 : f32 to vector<16x1xf32>
    %191 = arith.maximumf %182, %190 : vector<16x1xf32>
    %192 = math.rsqrt %191 : vector<16x1xf32>
    %193 = arith.mulf %189, %192 : vector<16x1xf32>
    %cst_85 = arith.constant 1.000000e+00 : f32
    %194 = vector.broadcast %cst_85 : f32 to vector<16x1xf32>
    %195 = arith.subf %194, %193 : vector<16x1xf32>
    %196 = arith.mulf %176, %195 : vector<16x1xf32>
    %cst_86 = arith.constant dense<0.000000e+00> : vector<1xf32>
    %197 = vector.multi_reduction <add>, %196, %cst_86 [0] : vector<16x1xf32> to vector<1xf32>
    %198 = vector.shape_cast %197 : vector<1xf32> to vector<1x1xf32>
    %cst_87 = arith.constant 1.250000e-01 : f32
    %199 = vector.broadcast %cst_87 : f32 to vector<1x1xf32>
    %200 = arith.mulf %198, %199 : vector<1x1xf32>
    %c0_88 = arith.constant 0 : index
    %c0_89 = arith.constant 0 : index
    %201 = vector.load %arg9[%c0_88, %c0_89] : memref<32x32xf32, #tpu.memory_space<vmem>>, vector<32x32xf32>
    %cst_90 = arith.constant dense<0.000000e+00> : vector<16x32xf32>
    %202 = tpu.matmul %0, %2, %cst_90 {dimension_numbers = #tpu.dot_dimension_numbers<[1], [0], [0], [1], [0, 0, 1, 1], [], []>} : vector<16x16xf32>, vector<16x32xf32>, vector<16x32xf32> -> vector<16x32xf32>
    %cst_91 = arith.constant dense<0.000000e+00> : vector<16x32xf32>
    %203 = tpu.matmul %202, %201, %cst_91 {dimension_numbers = #tpu.dot_dimension_numbers<[1], [0], [0], [1], [0, 0, 1, 1], [], []>} : vector<16x32xf32>, vector<32x32xf32>, vector<16x32xf32> -> vector<16x32xf32>
    %c0_92 = arith.constant 0 : index
    %c0_93 = arith.constant 0 : index
    %204 = vector.load %arg5[%c0_92, %c0_93] : memref<6x32xf32, #tpu.memory_space<vmem>>, vector<1x32xf32>
    %205 = vector.broadcast %204 : vector<1x32xf32> to vector<16x32xf32>
    %206 = arith.addf %203, %205 : vector<16x32xf32>
    %c0_94 = arith.constant 0 : index
    %207 = memref.load %arg7[%c0_94] : memref<4xf32, #tpu.memory_space<smem>>
    %cst_95 = arith.constant 0.000000e+00 : f32
    %208 = vector.broadcast %cst_95 : f32 to vector<16x32xf32>
    %209 = arith.cmpf ogt, %206, %208 : vector<16x32xf32>
    %210 = vector.broadcast %207 : f32 to vector<16x32xf32>
    %211 = arith.mulf %210, %206 : vector<16x32xf32>
    %212 = arith.select %209, %206, %211 : vector<16x32xi1>, vector<16x32xf32>
    %cst_96 = arith.constant dense<0.000000e+00> : vector<32xf32>
    %213 = vector.multi_reduction <add>, %212, %cst_96 [0] : vector<16x32xf32> to vector<32xf32>
    %214 = vector.shape_cast %213 : vector<32xf32> to vector<1x32xf32>
    %cst_97 = arith.constant 6.250000e-02 : f32
    %215 = vector.broadcast %cst_97 : f32 to vector<1x32xf32>
    %216 = arith.mulf %214, %215 : vector<1x32xf32>
    %217 = arith.mulf %212, %212 : vector<16x32xf32>
    %cst_98 = arith.constant dense<0.000000e+00> : vector<32xf32>
    %218 = vector.multi_reduction <add>, %217, %cst_98 [0] : vector<16x32xf32> to vector<32xf32>
    %219 = vector.shape_cast %218 : vector<32xf32> to vector<1x32xf32>
    %cst_99 = arith.constant 6.250000e-02 : f32
    %220 = vector.broadcast %cst_99 : f32 to vector<1x32xf32>
    %221 = arith.mulf %219, %220 : vector<1x32xf32>
    %222 = arith.mulf %216, %216 : vector<1x32xf32>
    %223 = arith.subf %221, %222 : vector<1x32xf32>
    %224 = vector.broadcast %216 : vector<1x32xf32> to vector<16x32xf32>
    %225 = arith.subf %212, %224 : vector<16x32xf32>
    %cst_100 = arith.constant 9.99999974E-6 : f32
    %226 = vector.broadcast %cst_100 : f32 to vector<1x32xf32>
    %227 = arith.addf %223, %226 : vector<1x32xf32>
    %228 = math.rsqrt %227 : vector<1x32xf32>
    %229 = vector.broadcast %228 : vector<1x32xf32> to vector<16x32xf32>
    %230 = arith.mulf %225, %229 : vector<16x32xf32>
    %c1_101 = arith.constant 1 : index
    %c0_102 = arith.constant 0 : index
    %231 = vector.load %arg5[%c1_101, %c0_102] : memref<6x32xf32, #tpu.memory_space<vmem>>, vector<1x32xf32>
    %232 = vector.broadcast %231 : vector<1x32xf32> to vector<16x32xf32>
    %233 = arith.mulf %230, %232 : vector<16x32xf32>
    %c2_103 = arith.constant 2 : index
    %c0_104 = arith.constant 0 : index
    %234 = vector.load %arg5[%c2_103, %c0_104] : memref<6x32xf32, #tpu.memory_space<vmem>>, vector<1x32xf32>
    %235 = vector.broadcast %234 : vector<1x32xf32> to vector<16x32xf32>
    %236 = arith.addf %233, %235 : vector<16x32xf32>
    %c1_105 = arith.constant 1 : index
    %237 = memref.load %arg7[%c1_105] : memref<4xf32, #tpu.memory_space<smem>>
    %cst_106 = arith.constant 0.000000e+00 : f32
    %238 = vector.broadcast %cst_106 : f32 to vector<16x32xf32>
    %239 = arith.cmpf ogt, %236, %238 : vector<16x32xf32>
    %240 = vector.broadcast %237 : f32 to vector<16x32xf32>
    %241 = arith.mulf %240, %236 : vector<16x32xf32>
    %242 = arith.select %239, %236, %241 : vector<16x32xi1>, vector<16x32xf32>
    %c0_107 = arith.constant 0 : index
    %c0_108 = arith.constant 0 : index
    %243 = vector.load %arg10[%c0_107, %c0_108] : memref<32x32xf32, #tpu.memory_space<vmem>>, vector<32x32xf32>
    %cst_109 = arith.constant dense<0.000000e+00> : vector<16x32xf32>
    %244 = tpu.matmul %0, %242, %cst_109 {dimension_numbers = #tpu.dot_dimension_numbers<[1], [0], [0], [1], [0, 0, 1, 1], [], []>} : vector<16x16xf32>, vector<16x32xf32>, vector<16x32xf32> -> vector<16x32xf32>
    %cst_110 = arith.constant dense<0.000000e+00> : vector<16x32xf32>
    %245 = tpu.matmul %244, %243, %cst_110 {dimension_numbers = #tpu.dot_dimension_numbers<[1], [0], [0], [1], [0, 0, 1, 1], [], []>} : vector<16x32xf32>, vector<32x32xf32>, vector<16x32xf32> -> vector<16x32xf32>
    %c3_111 = arith.constant 3 : index
    %c0_112 = arith.constant 0 : index
    %246 = vector.load %arg5[%c3_111, %c0_112] : memref<6x32xf32, #tpu.memory_space<vmem>>, vector<1x32xf32>
    %247 = vector.broadcast %246 : vector<1x32xf32> to vector<16x32xf32>
    %248 = arith.addf %245, %247 : vector<16x32xf32>
    %c2_113 = arith.constant 2 : index
    %249 = memref.load %arg7[%c2_113] : memref<4xf32, #tpu.memory_space<smem>>
    %cst_114 = arith.constant 0.000000e+00 : f32
    %250 = vector.broadcast %cst_114 : f32 to vector<16x32xf32>
    %251 = arith.cmpf ogt, %248, %250 : vector<16x32xf32>
    %252 = vector.broadcast %249 : f32 to vector<16x32xf32>
    %253 = arith.mulf %252, %248 : vector<16x32xf32>
    %254 = arith.select %251, %248, %253 : vector<16x32xi1>, vector<16x32xf32>
    %cst_115 = arith.constant dense<0.000000e+00> : vector<32xf32>
    %255 = vector.multi_reduction <add>, %254, %cst_115 [0] : vector<16x32xf32> to vector<32xf32>
    %256 = vector.shape_cast %255 : vector<32xf32> to vector<1x32xf32>
    %cst_116 = arith.constant 6.250000e-02 : f32
    %257 = vector.broadcast %cst_116 : f32 to vector<1x32xf32>
    %258 = arith.mulf %256, %257 : vector<1x32xf32>
    %259 = arith.mulf %254, %254 : vector<16x32xf32>
    %cst_117 = arith.constant dense<0.000000e+00> : vector<32xf32>
    %260 = vector.multi_reduction <add>, %259, %cst_117 [0] : vector<16x32xf32> to vector<32xf32>
    %261 = vector.shape_cast %260 : vector<32xf32> to vector<1x32xf32>
    %cst_118 = arith.constant 6.250000e-02 : f32
    %262 = vector.broadcast %cst_118 : f32 to vector<1x32xf32>
    %263 = arith.mulf %261, %262 : vector<1x32xf32>
    %264 = arith.mulf %258, %258 : vector<1x32xf32>
    %265 = arith.subf %263, %264 : vector<1x32xf32>
    %266 = vector.broadcast %258 : vector<1x32xf32> to vector<16x32xf32>
    %267 = arith.subf %254, %266 : vector<16x32xf32>
    %cst_119 = arith.constant 9.99999974E-6 : f32
    %268 = vector.broadcast %cst_119 : f32 to vector<1x32xf32>
    %269 = arith.addf %265, %268 : vector<1x32xf32>
    %270 = math.rsqrt %269 : vector<1x32xf32>
    %271 = vector.broadcast %270 : vector<1x32xf32> to vector<16x32xf32>
    %272 = arith.mulf %267, %271 : vector<16x32xf32>
    %c4_120 = arith.constant 4 : index
    %c0_121 = arith.constant 0 : index
    %273 = vector.load %arg5[%c4_120, %c0_121] : memref<6x32xf32, #tpu.memory_space<vmem>>, vector<1x32xf32>
    %274 = vector.broadcast %273 : vector<1x32xf32> to vector<16x32xf32>
    %275 = arith.mulf %272, %274 : vector<16x32xf32>
    %c5_122 = arith.constant 5 : index
    %c0_123 = arith.constant 0 : index
    %276 = vector.load %arg5[%c5_122, %c0_123] : memref<6x32xf32, #tpu.memory_space<vmem>>, vector<1x32xf32>
    %277 = vector.broadcast %276 : vector<1x32xf32> to vector<16x32xf32>
    %278 = arith.addf %275, %277 : vector<16x32xf32>
    %c3_124 = arith.constant 3 : index
    %279 = memref.load %arg7[%c3_124] : memref<4xf32, #tpu.memory_space<smem>>
    %cst_125 = arith.constant 0.000000e+00 : f32
    %280 = vector.broadcast %cst_125 : f32 to vector<16x32xf32>
    %281 = arith.cmpf ogt, %278, %280 : vector<16x32xf32>
    %282 = vector.broadcast %279 : f32 to vector<16x32xf32>
    %283 = arith.mulf %282, %278 : vector<16x32xf32>
    %284 = arith.select %281, %278, %283 : vector<16x32xi1>, vector<16x32xf32>
    %285 = vector.broadcast %4 : vector<16x1xf32> to vector<16x32xf32>
    %286 = arith.mulf %2, %285 : vector<16x32xf32>
    %c0_126 = arith.constant 0 : index
    %c0_127 = arith.constant 0 : index
    %287 = vector.load %arg11[%c0_126, %c0_127] : memref<32x32xf32, #tpu.memory_space<vmem>>, vector<32x32xf32>
    %cst_128 = arith.constant dense<0.000000e+00> : vector<16x32xf32>
    %288 = tpu.matmul %1, %286, %cst_128 {dimension_numbers = #tpu.dot_dimension_numbers<[1], [0], [0], [1], [0, 0, 1, 1], [], []>} : vector<16x16xf32>, vector<16x32xf32>, vector<16x32xf32> -> vector<16x32xf32>
    %cst_129 = arith.constant dense<0.000000e+00> : vector<16x32xf32>
    %289 = tpu.matmul %288, %287, %cst_129 {dimension_numbers = #tpu.dot_dimension_numbers<[1], [0], [0], [1], [0, 0, 1, 1], [], []>} : vector<16x32xf32>, vector<32x32xf32>, vector<16x32xf32> -> vector<16x32xf32>
    %c0_130 = arith.constant 0 : index
    %c0_131 = arith.constant 0 : index
    %290 = vector.load %arg6[%c0_130, %c0_131] : memref<6x32xf32, #tpu.memory_space<vmem>>, vector<1x32xf32>
    %291 = vector.broadcast %290 : vector<1x32xf32> to vector<16x32xf32>
    %292 = arith.addf %289, %291 : vector<16x32xf32>
    %c0_132 = arith.constant 0 : index
    %293 = memref.load %arg8[%c0_132] : memref<4xf32, #tpu.memory_space<smem>>
    %cst_133 = arith.constant 0.000000e+00 : f32
    %294 = vector.broadcast %cst_133 : f32 to vector<16x32xf32>
    %295 = arith.cmpf ogt, %292, %294 : vector<16x32xf32>
    %296 = vector.broadcast %293 : f32 to vector<16x32xf32>
    %297 = arith.mulf %296, %292 : vector<16x32xf32>
    %298 = arith.select %295, %292, %297 : vector<16x32xi1>, vector<16x32xf32>
    %cst_134 = arith.constant dense<0.000000e+00> : vector<32xf32>
    %299 = vector.multi_reduction <add>, %298, %cst_134 [0] : vector<16x32xf32> to vector<32xf32>
    %300 = vector.shape_cast %299 : vector<32xf32> to vector<1x32xf32>
    %cst_135 = arith.constant 6.250000e-02 : f32
    %301 = vector.broadcast %cst_135 : f32 to vector<1x32xf32>
    %302 = arith.mulf %300, %301 : vector<1x32xf32>
    %303 = arith.mulf %298, %298 : vector<16x32xf32>
    %cst_136 = arith.constant dense<0.000000e+00> : vector<32xf32>
    %304 = vector.multi_reduction <add>, %303, %cst_136 [0] : vector<16x32xf32> to vector<32xf32>
    %305 = vector.shape_cast %304 : vector<32xf32> to vector<1x32xf32>
    %cst_137 = arith.constant 6.250000e-02 : f32
    %306 = vector.broadcast %cst_137 : f32 to vector<1x32xf32>
    %307 = arith.mulf %305, %306 : vector<1x32xf32>
    %308 = arith.mulf %302, %302 : vector<1x32xf32>
    %309 = arith.subf %307, %308 : vector<1x32xf32>
    %310 = vector.broadcast %302 : vector<1x32xf32> to vector<16x32xf32>
    %311 = arith.subf %298, %310 : vector<16x32xf32>
    %cst_138 = arith.constant 9.99999974E-6 : f32
    %312 = vector.broadcast %cst_138 : f32 to vector<1x32xf32>
    %313 = arith.addf %309, %312 : vector<1x32xf32>
    %314 = math.rsqrt %313 : vector<1x32xf32>
    %315 = vector.broadcast %314 : vector<1x32xf32> to vector<16x32xf32>
    %316 = arith.mulf %311, %315 : vector<16x32xf32>
    %c1_139 = arith.constant 1 : index
    %c0_140 = arith.constant 0 : index
    %317 = vector.load %arg6[%c1_139, %c0_140] : memref<6x32xf32, #tpu.memory_space<vmem>>, vector<1x32xf32>
    %318 = vector.broadcast %317 : vector<1x32xf32> to vector<16x32xf32>
    %319 = arith.mulf %316, %318 : vector<16x32xf32>
    %c2_141 = arith.constant 2 : index
    %c0_142 = arith.constant 0 : index
    %320 = vector.load %arg6[%c2_141, %c0_142] : memref<6x32xf32, #tpu.memory_space<vmem>>, vector<1x32xf32>
    %321 = vector.broadcast %320 : vector<1x32xf32> to vector<16x32xf32>
    %322 = arith.addf %319, %321 : vector<16x32xf32>
    %c1_143 = arith.constant 1 : index
    %323 = memref.load %arg8[%c1_143] : memref<4xf32, #tpu.memory_space<smem>>
    %cst_144 = arith.constant 0.000000e+00 : f32
    %324 = vector.broadcast %cst_144 : f32 to vector<16x32xf32>
    %325 = arith.cmpf ogt, %322, %324 : vector<16x32xf32>
    %326 = vector.broadcast %323 : f32 to vector<16x32xf32>
    %327 = arith.mulf %326, %322 : vector<16x32xf32>
    %328 = arith.select %325, %322, %327 : vector<16x32xi1>, vector<16x32xf32>
    %c0_145 = arith.constant 0 : index
    %c0_146 = arith.constant 0 : index
    %329 = vector.load %arg12[%c0_145, %c0_146] : memref<32x32xf32, #tpu.memory_space<vmem>>, vector<32x32xf32>
    %cst_147 = arith.constant dense<0.000000e+00> : vector<16x32xf32>
    %330 = tpu.matmul %1, %328, %cst_147 {dimension_numbers = #tpu.dot_dimension_numbers<[1], [0], [0], [1], [0, 0, 1, 1], [], []>} : vector<16x16xf32>, vector<16x32xf32>, vector<16x32xf32> -> vector<16x32xf32>
    %cst_148 = arith.constant dense<0.000000e+00> : vector<16x32xf32>
    %331 = tpu.matmul %330, %329, %cst_148 {dimension_numbers = #tpu.dot_dimension_numbers<[1], [0], [0], [1], [0, 0, 1, 1], [], []>} : vector<16x32xf32>, vector<32x32xf32>, vector<16x32xf32> -> vector<16x32xf32>
    %c3_149 = arith.constant 3 : index
    %c0_150 = arith.constant 0 : index
    %332 = vector.load %arg6[%c3_149, %c0_150] : memref<6x32xf32, #tpu.memory_space<vmem>>, vector<1x32xf32>
    %333 = vector.broadcast %332 : vector<1x32xf32> to vector<16x32xf32>
    %334 = arith.addf %331, %333 : vector<16x32xf32>
    %c2_151 = arith.constant 2 : index
    %335 = memref.load %arg8[%c2_151] : memref<4xf32, #tpu.memory_space<smem>>
    %cst_152 = arith.constant 0.000000e+00 : f32
    %336 = vector.broadcast %cst_152 : f32 to vector<16x32xf32>
    %337 = arith.cmpf ogt, %334, %336 : vector<16x32xf32>
    %338 = vector.broadcast %335 : f32 to vector<16x32xf32>
    %339 = arith.mulf %338, %334 : vector<16x32xf32>
    %340 = arith.select %337, %334, %339 : vector<16x32xi1>, vector<16x32xf32>
    %cst_153 = arith.constant dense<0.000000e+00> : vector<32xf32>
    %341 = vector.multi_reduction <add>, %340, %cst_153 [0] : vector<16x32xf32> to vector<32xf32>
    %342 = vector.shape_cast %341 : vector<32xf32> to vector<1x32xf32>
    %cst_154 = arith.constant 6.250000e-02 : f32
    %343 = vector.broadcast %cst_154 : f32 to vector<1x32xf32>
    %344 = arith.mulf %342, %343 : vector<1x32xf32>
    %345 = arith.mulf %340, %340 : vector<16x32xf32>
    %cst_155 = arith.constant dense<0.000000e+00> : vector<32xf32>
    %346 = vector.multi_reduction <add>, %345, %cst_155 [0] : vector<16x32xf32> to vector<32xf32>
    %347 = vector.shape_cast %346 : vector<32xf32> to vector<1x32xf32>
    %cst_156 = arith.constant 6.250000e-02 : f32
    %348 = vector.broadcast %cst_156 : f32 to vector<1x32xf32>
    %349 = arith.mulf %347, %348 : vector<1x32xf32>
    %350 = arith.mulf %344, %344 : vector<1x32xf32>
    %351 = arith.subf %349, %350 : vector<1x32xf32>
    %352 = vector.broadcast %344 : vector<1x32xf32> to vector<16x32xf32>
    %353 = arith.subf %340, %352 : vector<16x32xf32>
    %cst_157 = arith.constant 9.99999974E-6 : f32
    %354 = vector.broadcast %cst_157 : f32 to vector<1x32xf32>
    %355 = arith.addf %351, %354 : vector<1x32xf32>
    %356 = math.rsqrt %355 : vector<1x32xf32>
    %357 = vector.broadcast %356 : vector<1x32xf32> to vector<16x32xf32>
    %358 = arith.mulf %353, %357 : vector<16x32xf32>
    %c4_158 = arith.constant 4 : index
    %c0_159 = arith.constant 0 : index
    %359 = vector.load %arg6[%c4_158, %c0_159] : memref<6x32xf32, #tpu.memory_space<vmem>>, vector<1x32xf32>
    %360 = vector.broadcast %359 : vector<1x32xf32> to vector<16x32xf32>
    %361 = arith.mulf %358, %360 : vector<16x32xf32>
    %c5_160 = arith.constant 5 : index
    %c0_161 = arith.constant 0 : index
    %362 = vector.load %arg6[%c5_160, %c0_161] : memref<6x32xf32, #tpu.memory_space<vmem>>, vector<1x32xf32>
    %363 = vector.broadcast %362 : vector<1x32xf32> to vector<16x32xf32>
    %364 = arith.addf %361, %363 : vector<16x32xf32>
    %c3_162 = arith.constant 3 : index
    %365 = memref.load %arg8[%c3_162] : memref<4xf32, #tpu.memory_space<smem>>
    %cst_163 = arith.constant 0.000000e+00 : f32
    %366 = vector.broadcast %cst_163 : f32 to vector<16x32xf32>
    %367 = arith.cmpf ogt, %364, %366 : vector<16x32xf32>
    %368 = vector.broadcast %365 : f32 to vector<16x32xf32>
    %369 = arith.mulf %368, %364 : vector<16x32xf32>
    %370 = arith.select %367, %364, %369 : vector<16x32xi1>, vector<16x32xf32>
    %cst_164 = arith.constant 1.000000e+00 : f32
    %371 = vector.broadcast %cst_164 : f32 to vector<16x1xf32>
    %372 = arith.subf %371, %4 : vector<16x1xf32>
    %373 = arith.mulf %284, %284 : vector<16x32xf32>
    %cst_165 = arith.constant dense<0.000000e+00> : vector<16xf32>
    %374 = vector.multi_reduction <add>, %373, %cst_165 [1] : vector<16x32xf32> to vector<16xf32>
    %375 = vector.shape_cast %374 : vector<16xf32> to vector<16x1xf32>
    %376 = arith.mulf %370, %370 : vector<16x32xf32>
    %cst_166 = arith.constant dense<0.000000e+00> : vector<16xf32>
    %377 = vector.multi_reduction <add>, %376, %cst_166 [1] : vector<16x32xf32> to vector<16xf32>
    %378 = vector.shape_cast %377 : vector<16xf32> to vector<16x1xf32>
    %379 = arith.mulf %284, %370 : vector<16x32xf32>
    %cst_167 = arith.constant dense<0.000000e+00> : vector<16xf32>
    %380 = vector.multi_reduction <add>, %379, %cst_167 [1] : vector<16x32xf32> to vector<16xf32>
    %381 = vector.shape_cast %380 : vector<16xf32> to vector<16x1xf32>
    %cst_168 = arith.constant 1.000000e-24 : f32
    %382 = vector.broadcast %cst_168 : f32 to vector<16x1xf32>
    %383 = arith.maximumf %375, %382 : vector<16x1xf32>
    %384 = math.rsqrt %383 : vector<16x1xf32>
    %385 = arith.mulf %381, %384 : vector<16x1xf32>
    %cst_169 = arith.constant 1.000000e-24 : f32
    %386 = vector.broadcast %cst_169 : f32 to vector<16x1xf32>
    %387 = arith.maximumf %378, %386 : vector<16x1xf32>
    %388 = math.rsqrt %387 : vector<16x1xf32>
    %389 = arith.mulf %385, %388 : vector<16x1xf32>
    %cst_170 = arith.constant 1.000000e+00 : f32
    %390 = vector.broadcast %cst_170 : f32 to vector<16x1xf32>
    %391 = arith.subf %390, %389 : vector<16x1xf32>
    %392 = arith.mulf %372, %391 : vector<16x1xf32>
    %cst_171 = arith.constant dense<0.000000e+00> : vector<1xf32>
    %393 = vector.multi_reduction <add>, %392, %cst_171 [0] : vector<16x1xf32> to vector<1xf32>
    %394 = vector.shape_cast %393 : vector<1xf32> to vector<1x1xf32>
    %cst_172 = arith.constant 2.500000e-01 : f32
    %395 = vector.broadcast %cst_172 : f32 to vector<1x1xf32>
    %396 = arith.mulf %394, %395 : vector<1x1xf32>
    %cst_173 = arith.constant 6.000000e-01 : f32
    %397 = vector.broadcast %cst_173 : f32 to vector<1x1xf32>
    %398 = arith.mulf %397, %200 : vector<1x1xf32>
    %cst_174 = arith.constant 4.000000e-01 : f32
    %399 = vector.broadcast %cst_174 : f32 to vector<1x1xf32>
    %400 = arith.mulf %399, %396 : vector<1x1xf32>
    %401 = arith.addf %398, %400 : vector<1x1xf32>
    %c0_175 = arith.constant 0 : index
    %c0_176 = arith.constant 0 : index
    %402 = vector.load %arg13[%c0_175, %c0_176] : memref<1x1xf32, #tpu.memory_space<vmem>>, vector<1x1xf32>
    tpu.vector_store %arg13[%c0_175, %c0_176], %401 {strides = array<i32>} : memref<1x1xf32, #tpu.memory_space<vmem>>, vector<1x1xf32>,
    return
  }
}

</mosaic_0001>

<bundles_post_ra>
// kernel: tpu_custom_call.1
= control target key start
LH: loop header
LB: loop body
LE: loop exit
PB: predicated region body
PF: predicated region fallthrough
CT: control target
= control target key end

     0   :  { %18 = vsyncpa [#allocation3], 0  ;;  %s3259_s0 = inlined_call_operand.hbm [shape: f32[16,16], index: 0, kind: input, shape index: {}]   ;;  %s3260_s1 = inlined_call_operand.hbm [shape: f32[16,16], index: 1, kind: input, shape index: {}]   ;;  %s3261_s2 = inlined_call_operand.hbm [shape: f32[16,32], index: 2, kind: input, shape index: {}]   ;;  %s3262_s3 = inlined_call_operand.vmem [shape: f32[16,1], index: 3, kind: input, shape index: {}]   ;;  %s3263_s4 = inlined_call_operand.vmem [shape: f32[16,1], index: 4, kind: input, shape index: {}]   ;;  %s3264_s5 = inlined_call_operand.hbm [shape: f32[6,32], index: 5, kind: input, shape index: {}]   ;;  %s3265_s6 = inlined_call_operand.hbm [shape: f32[6,32], index: 6, kind: input, shape index: {}]   ;;  %s3266_s7 = inlined_call_operand.hbm [shape: f32[4], index: 7, kind: input, shape index: {}]   ;;  %s3267_s8 = inlined_call_operand.hbm [shape: f32[4], index: 8, kind: input, shape index: {}]   ;;  %s3268_s9 = inlined_call_operand.vmem [shape: f32[32,32], index: 9, kind: input, shape index: {}]   ;;  %s3269_s10 = inlined_call_operand.vmem [shape: f32[32,32], index: 10, kind: input, shape index: {}]   ;;  %s3270_s11 = inlined_call_operand.hbm [shape: f32[32,32], index: 11, kind: input, shape index: {}]   ;;  %s3271_s12 = inlined_call_operand.hbm [shape: f32[32,32], index: 12, kind: input, shape index: {}]   ;;  %s3272_s13 = inlined_call_operand.hbm [shape: f32[1,1], index: 13, kind: output, shape index: {}]  }
   0x1   :  { %19 = vsyncpa [#allocation7], 0 }
   0x2   :  { %20 = vsyncpa [#allocation10], 0 }
   0x3   :  { %21 = vsyncpa [#allocation5], 0 }
   0x4   :  { %22 = vsyncpa [#allocation14], 0 }
   0x5   :  { %23 = vsyncpa [#allocation16], 0 }
   0x6   :  { %24 = vsyncpa [#allocation4], 0  ;;  %s2674_s25 = smov [#allocation6]   ;;  %s2675_s27 = smov [#allocation9]  }
   0x7   :  { %s42_s26 = sshll.u32 %s2674_s25, 4  ;;  %s71_s28 = sshll.u32 %s2675_s27, 4  ;;  %s43_s26 = int_to_ptr.vmem [resolvable:$true] %s42_s26  ;;  %s72_s28 = int_to_ptr.vmem [resolvable:$true] %s71_s28 }
   0x8   :  { %s2464_s14 = scalar_lea.hbm %s3260_s1, 256 }
   0x9   :  { %p2465_p0 = scmp.ne.s32.totalorder %s3260_s1, %s2464_s14  ;;  %p2468_p1 = scmp.lt.u32.totalorder %s2464_s14, %s3260_s1 }
   0xb   :  { %p2470_p2 = pnand %p2468_p1, %p2465_p0 }
   0xd   :  { %2473 = shalt.err (!%p2470_p2)
}
   0xe   :  { %s2474_s19 = scalar_lea.vmem %s43_s26, 256  ;;  %p2479_p4 = scmp.lt.s32.totalorder %s43_s26, %s43_s26 }
   0xf   :  { %p2475_p3 = scmp.ne.s32.totalorder %s43_s26, %s2474_s19  ;;  %p2480_p5 = scmp.lt.s32.totalorder %s2474_s19, %s2474_s19 }
  0x11   :  { %p2481_p6 = por %p2480_p5, %p2479_p4 }
  0x13   :  { %p2482_p7 = pnand %p2481_p6, %p2475_p3 }
  0x15   :  { %2485 = shalt.err (!%p2482_p7)
}
  0x16   :  { %s2676_s20 = smov 128   ;;  %s2677_s21 = smov 8  }
  0x17   :  { %48 = dma.hbm_to_vmem [thread:$0]  %s3260_s1, 256, %s43_s26, [#allocation7], %s2676_s20, %s2676_s20, %s2677_s21  }
  0x18   :  { %s2486_s27 = scalar_lea.hbm %s3264_s5, 128 }
  0x19   :  { %p2487_p8 = scmp.ne.s32.totalorder %s3264_s5, %s2486_s27  ;;  %p2490_p9 = scmp.lt.u32.totalorder %s2486_s27, %s3264_s5 }
  0x1b   :  { %p2492_p10 = pnand %p2490_p9, %p2487_p8 }
  0x1d   :  { %2495 = shalt.err (!%p2492_p10)
}
  0x1e   :  { %s2496_s16 = scalar_lea.vmem %s72_s28, 128  ;;  %p2501_p12 = scmp.lt.s32.totalorder %s72_s28, %s72_s28 }
  0x1f   :  { %p2497_p11 = scmp.ne.s32.totalorder %s72_s28, %s2496_s16  ;;  %p2502_p13 = scmp.lt.s32.totalorder %s2496_s16, %s2496_s16 }
  0x21   :  { %p2503_p0 = por %p2502_p13, %p2501_p12 }
  0x23   :  { %p2504_p1 = pnand %p2503_p0, %p2497_p11 }
  0x25   :  { %2507 = shalt.err (!%p2504_p1)
}
  0x26   :  { %74 = dma.hbm_to_vmem [thread:$0]  %s3264_s5, 128, %s72_s28, [#allocation10]  }
  0x27   :  { %s2678_s17 = smov [#allocation15]   ;;  %s2679_s19 = smov [#allocation2]  }
  0x28   :  { %s110_s18 = sshll.u32 %s2678_s17, 4  ;;  %s30_s22 = sshll.u32 %s2679_s19, 4  ;;  %s111_s18 = int_to_ptr.vmem [resolvable:$true] %s110_s18  ;;  %s2784_s22 = int_to_ptr.vmem [resolvable:$true] %s30_s22 }
  0x29   :  { %s2508_s25 = scalar_lea.hbm %s3270_s11, 512 }
  0x2a   :  { %p2509_p2 = scmp.ne.s32.totalorder %s3270_s11, %s2508_s25  ;;  %p2512_p3 = scmp.lt.u32.totalorder %s2508_s25, %s3270_s11 }
  0x2c   :  { %p2514_p4 = pnand %p2512_p3, %p2509_p2 }
  0x2e   :  { %2517 = shalt.err (!%p2514_p4)
}
  0x2f   :  { %s2518_s5 = scalar_lea.vmem %s111_s18, 512  ;;  %p2523_p6 = scmp.lt.s32.totalorder %s111_s18, %s111_s18 }
  0x30   :  { %p2519_p5 = scmp.ne.s32.totalorder %s111_s18, %s2518_s5  ;;  %p2524_p7 = scmp.lt.s32.totalorder %s2518_s5, %s2518_s5 }
  0x32   :  { %p2525_p8 = por %p2524_p7, %p2523_p6 }
  0x34   :  { %p2526_p9 = pnand %p2525_p8, %p2519_p5 }
  0x36   :  { %2529 = shalt.err (!%p2526_p9)
}
  0x37   :  { %116 = dma.hbm_to_vmem [thread:$0]  %s3270_s11, 512, %s111_s18, [#allocation16], %s2676_s20, %s2676_s20, %s2677_s21  }
  0x38   :  { %s2530_s26 = scalar_lea.hbm %s3259_s0, 256 }
  0x39   :  { %p2531_p10 = scmp.ne.s32.totalorder %s3259_s0, %s2530_s26  ;;  %p2534_p11 = scmp.lt.u32.totalorder %s2530_s26, %s3259_s0 }
  0x3b   :  { %p2536_p12 = pnand %p2534_p11, %p2531_p10 }
  0x3d   :  { %2539 = shalt.err (!%p2536_p12)
}
  0x3e   :  { %s2540_s25 = scalar_lea.vmem %s2784_s22, 256  ;;  %p2545_p0 = scmp.lt.s32.totalorder %s2784_s22, %s2784_s22 }
  0x3f   :  { %p2541_p13 = scmp.ne.s32.totalorder %s2784_s22, %s2540_s25  ;;  %p2546_p1 = scmp.lt.s32.totalorder %s2540_s25, %s2540_s25 }
  0x41   :  { %p2547_p2 = por %p2546_p1, %p2545_p0 }
  0x43   :  { %p2548_p3 = pnand %p2547_p2, %p2541_p13 }
  0x45   :  { %2551 = shalt.err (!%p2548_p3)
}
  0x46   :  { %36 = dma.hbm_to_vmem [thread:$0]  %s3259_s0, 256, %s2784_s22, [#allocation3], %s2676_s20, %s2676_s20, %s2677_s21  }
  0x47   :  { %s2680_s27 = smov [#allocation8]   ;;  %s2681_s30 = smov [#allocation11]  }
  0x48   :  { %s54_s29 = sshll.u32 %s2680_s27, 4  ;;  %s81_s14 = sshll.u32 %s2681_s30, 4  ;;  %s55_s29 = int_to_ptr.vmem [resolvable:$true] %s54_s29  ;;  %s82_s14 = int_to_ptr.vmem [resolvable:$true] %s81_s14 }
  0x49   :  { %s2552_s15 = scalar_lea.hbm %s3261_s2, 256 }
  0x4a   :  { %p2553_p4 = scmp.ne.s32.totalorder %s3261_s2, %s2552_s15  ;;  %p2556_p5 = scmp.lt.u32.totalorder %s2552_s15, %s3261_s2 }
  0x4c   :  { %p2558_p6 = pnand %p2556_p5, %p2553_p4 }
  0x4e   :  { %2561 = shalt.err (!%p2558_p6)
}
  0x4f   :  { %s2562_s0 = scalar_lea.vmem %s55_s29, 256  ;;  %p2567_p8 = scmp.lt.s32.totalorder %s55_s29, %s55_s29 }
  0x50   :  { %p2563_p7 = scmp.ne.s32.totalorder %s55_s29, %s2562_s0  ;;  %p2568_p9 = scmp.lt.s32.totalorder %s2562_s0, %s2562_s0 }
  0x52   :  { %p2569_p10 = por %p2568_p9, %p2567_p8 }
  0x54   :  { %p2570_p11 = pnand %p2569_p10, %p2563_p7 }
  0x56   :  { %2573 = shalt.err (!%p2570_p11)
}
  0x57   :  { %60 = dma.hbm_to_vmem [thread:$0]  %s3261_s2, 256, %s55_s29, [#allocation7], %s2676_s20, %s2676_s20, %s2677_s21  }
  0x58   :  { %s2574_s25 = scalar_lea.hbm %s3265_s6, 128 }
  0x59   :  { %p2575_p12 = scmp.ne.s32.totalorder %s3265_s6, %s2574_s25  ;;  %p2578_p13 = scmp.lt.u32.totalorder %s2574_s25, %s3265_s6 }
  0x5b   :  { %p2580_p0 = pnand %p2578_p13, %p2575_p12 }
  0x5d   :  { %2583 = shalt.err (!%p2580_p0)
}
  0x5e   :  { %s2584_s5 = scalar_lea.vmem %s82_s14, 128  ;;  %p2589_p2 = scmp.lt.s32.totalorder %s82_s14, %s82_s14 }
  0x5f   :  { %p2585_p1 = scmp.ne.s32.totalorder %s82_s14, %s2584_s5  ;;  %p2590_p3 = scmp.lt.s32.totalorder %s2584_s5, %s2584_s5 }
  0x61   :  { %p2591_p4 = por %p2590_p3, %p2589_p2 }
  0x63   :  { %p2592_p5 = pnand %p2591_p4, %p2585_p1 }
  0x65   :  { %2595 = shalt.err (!%p2592_p5)
}
  0x66   :  { %84 = dma.hbm_to_vmem [thread:$0]  %s3265_s6, 128, %s82_s14, [#allocation10]  }
  0x67   :  { %s2596_s16 = scalar_lea.hbm %s3266_s7, 16 }
  0x68   :  { %p2597_p6 = scmp.ne.s32.totalorder %s3266_s7, %s2596_s16  ;;  %p2600_p7 = scmp.lt.u32.totalorder %s2596_s16, %s3266_s7 }
  0x6a   :  { %p2602_p8 = pnand %p2600_p7, %p2597_p6 }
  0x6c   :  { %2605 = shalt.err (!%p2602_p8)
}
  0x6d   :  { %s2682_s22 = smov [#allocation12]   ;;  %s2606_s24 = scalar_lea.hbm %s3267_s8, 16 }
  0x6e   :  { %92 = dma.hbm_to_smem %s3266_s7, 16, %s2682_s22, [#allocation5]  }
  0x6f   :  { %p2607_p9 = scmp.ne.s32.totalorder %s3267_s8, %s2606_s24  ;;  %p2610_p10 = scmp.lt.u32.totalorder %s2606_s24, %s3267_s8 }
  0x71   :  { %p2612_p11 = pnand %p2610_p10, %p2607_p9 }
  0x73   :  { %2615 = shalt.err (!%p2612_p11)
}
  0x74   :  { %s2683_s30 = smov [#allocation13]   ;;  %s2684_s7 = smov [#allocation17]  }
  0x75   :  { %100 = dma.hbm_to_smem %s3267_s8, 16, %s2683_s30, [#allocation14]  }
  0x76   :  { %s122_s29 = sshll.u32 %s2684_s7, 4  ;;  %s2616_s16 = scalar_lea.hbm %s3271_s12, 512  ;;  %s123_s29 = int_to_ptr.vmem [resolvable:$true] %s122_s29 }
  0x77   :  { %p2617_p12 = scmp.ne.s32.totalorder %s3271_s12, %s2616_s16  ;;  %p2620_p13 = scmp.lt.u32.totalorder %s2616_s16, %s3271_s12 }
  0x79   :  { %p2622_p0 = pnand %p2620_p13, %p2617_p12 }
  0x7b   :  { %2625 = shalt.err (!%p2622_p0)
}
  0x7c   :  { %s2626_s22 = scalar_lea.vmem %s123_s29, 512  ;;  %p2631_p2 = scmp.lt.s32.totalorder %s123_s29, %s123_s29 }
  0x7d   :  { %p2627_p1 = scmp.ne.s32.totalorder %s123_s29, %s2626_s22  ;;  %p2632_p3 = scmp.lt.s32.totalorder %s2626_s22, %s2626_s22 }
  0x7f   :  { %p2633_p4 = por %p2632_p3, %p2631_p2 }
  0x81   :  { %p2634_p5 = pnand %p2633_p4, %p2627_p1 }
  0x83   :  { %2637 = shalt.err (!%p2634_p5)
}
  0x84   :  { %128 = dma.hbm_to_vmem [thread:$0]  %s3271_s12, 512, %s123_s29, [#allocation16], %s2676_s20, %s2676_s20, %s2677_s21  }
  0x85   :  { %2660 = dma.done.wait [#allocation3], 256  }
  0x86   :  { %2661 = vsyncadd [#allocation3], 4294967040 }
  0x87   :  { %2662 = dma.done.wait [#allocation7], 512  }
  0x88   :  { %2663 = vsyncadd [#allocation7], 4294966784 }
  0x89   :  { %2664 = dma.done.wait [#allocation10], 256  }
  0x8a   :  { %2665 = vsyncadd [#allocation10], 4294967040 }
  0x8b   :  { %2666 = dma.done.wait [#allocation5], 16  }
  0x8c   :  { %2667 = vsyncadd [#allocation5], 4294967280 }
  0x8d   :  { %2668 = dma.done.wait [#allocation14], 16  }
  0x8e   :  { %2669 = vsyncadd [#allocation14], 4294967280 }
  0x8f   :  { %2670 = dma.done.wait [#allocation16], 1024  }
  0x90   :  { %2671 = vsyncadd [#allocation16], 4294966272 }
  0x91   :  { %156 = sfence }
  0x92   :  { %v163_v0 = vld [vmem:[%s3262_s3] sm:$0xff]  ;;  %v2685_v1 = vmov 0   ;;  %v164_v2 = vld [vmem:[%s3262_s3 + $0x8] sm:$0xff]  ;;  %vm183_vm0 = vcmask 130048   ;;  %v181_v14 = vld [vmem:[%s3268_s9 + $0x10] sm:$0xff]  ;;  %vm270_vm1 = vcmask 261120  }
  0x93   :  { %2426 = vset.pattern.permute.xlu0 %v2685_v1  ;;  %2427 = vset.pattern.permute.xlu1 %v2685_v1  ;;  %v2893_v3 = vld [vmem:[#allocation2] sm:$0xff]  ;;  %v2901_v6 = vld [vmem:[#allocation8 + $0x8] sm:$0xff]  ;;  %v182_v15 = vld [vmem:[%s3268_s9 + $0x18] sm:$0xff]  ;;  %s352_s29 = sld [smem:[#allocation12]]  ;;  %s2050_s28 = sld [smem:[#allocation12 + $0x1]] }
  0x94   :  { %169 = vperm.xlu0 %2426, %v163_v0   ;;  %2177 = vmatprep.mubr.msk.f32.mxu1 %vm183_vm0, %v2893_v3  ;;  %v2899_v5 = vld [vmem:[#allocation8] sm:$0xff]  ;;  %v180_v9 = vld [vmem:[%s3268_s9 + $0x8] sm:$0xff]  ;;  %v2922_v17 = vpack.c.bf16 %v182_v15, %v181_v14  ;;  %v2931_v23 = vld [vmem:[#allocation6] sm:$0xff]  ;;  %s808_s19 = sld [smem:[#allocation13]]  ;;  %s2056_s23 = sld [smem:[#allocation12 + $0x2]] }
  0x95   :  { %2195 = vmatprep.mubr.msk.f32.mxu0 %vm183_vm0, %v2893_v3  ;;  %v179_v8 = vld [vmem:[%s3268_s9] sm:$0xff]  ;;  %v2919_v16 = vld [vmem:[#allocation2 + $0x8] sm:$0xff]  ;;  %v2341_v18 = vpack.c.bf16 %v2901_v6, %v2899_v5  ;;  %v2939_v25 = vld [vmem:[#allocation6 + $0x8] sm:$0xff]  ;;  %s2059_s6 = sld [smem:[#allocation12 + $0x3]]  ;;  %s2073_s12 = sld [smem:[#allocation13 + $0x2]] }
  0x96   :  { %v2911_v13 = vpack.c.bf16 %v180_v9, %v179_v8  ;;  %v637_v19 = vld [vmem:[#allocation15] sm:$0xff]  ;;  %v638_v20 = vld [vmem:[#allocation15 + $0x8] sm:$0xff]  ;;  %v639_v26 = vld [vmem:[#allocation15 + $0x10] sm:$0xff]  ;;  %s2076_s20 = sld [smem:[#allocation13 + $0x3]] }
  0x97   :  { %v2933_v24 = vpack.c.bf16 %v638_v20, %v637_v19  ;;  %v640_v27 = vld [vmem:[#allocation15 + $0x18] sm:$0xff]  ;;  %v165_v29 = vld [vmem:[%s3263_s4] sm:$0xff]  ;;  %v166_v30 = vld [vmem:[%s3263_s4 + $0x8] sm:$0xff] }
  0x98   :  { %174 = vperm.xlu0 %2426, %v164_v2   ;;  %v2945_v28 = vpack.c.bf16 %v640_v27, %v639_v26  ;;  %1552 = vperm.xlu1 %2427, %v165_v29   ;;  %v2955_v31 = vld [vmem:[#allocation9] ss:$0 sm:$0xff] }
  0x99   :  { %v2957_v33 = vstv %s352_s29 }
  0x9c   :  { %1557 = vperm.xlu1 %2427, %v166_v30  }
 0x113   :  { %v170_v4 = vpop.permute.xlu0 %169 }
 0x114   :  { %v177_v10 = vmul.f32 %v170_v4, %v2899_v5 }
 0x117   :  { %v175_v7 = vpop.permute.xlu0 %174  ;;  %v1553_v29 = vpop.permute.xlu1 %1552 }
 0x118   :  { %v178_v11 = vmul.f32 %v175_v7, %v2901_v6  ;;  %v1560_v30 = vmul.f32 %v1553_v29, %v2899_v5  ;;  %v415_v5 = vld [vmem:[%s3269_s10 + $0x18] sm:$0xff] }
 0x11a   :  { %v2317_v12 = vpack.c.bf16 %v178_v11, %v177_v10  ;;  %v2977_v10 = vld [vmem:[#allocation9 + $0x1] ss:$0 sm:$0xff] }
 0x11c   :  { %2318 = vmatprep.subr.bf16.mxu1 %v2317_v12 }
 0x11d   :  { %2320 = vmatpush3.bf16.msra.mxu1 %v2317_v12 }
 0x11e   :  { %2322 = vmatprep.subr.bf16.mxu1 %v2911_v13 }
 0x120   :  { %2178 = vmatmul.mubr.msk.f32.vlgmr.msra.gmra.mrb[0].mxu1 %vm183_vm0, %v2919_v16 }
 0x121   :  { %2324 = vmatpush3.bf16.msra.mxu1 %v2911_v13 }
 0x122   :  { %2326 = vmatprep.subr.bf16.mxu1 %v2922_v17 }
 0x125   :  { %2328 = vmatpush3.bf16.msra.mxu1 %v2922_v17 }
 0x126   :  { %2342 = vmatprep.subr.bf16.mxu1 %v2341_v18 }
 0x1f3   :  { %v2179_v21 = vpop.f32.mrb[0].mxu1 }
 0x1f4   :  { %v256_v22 = vpop.f32.mrb[1].mxu1 }
 0x1f5   :  { %2188 = vmatprep.mubr.msk.f32.mxu1 %vm270_vm1, %v256_v22 }
 0x1f6   :  { %2189 = vmatmul.mubr.msk.f32.vlgmr.msra.gmra.mrb[2].mxu1 %vm270_vm1, %v2179_v21 }
 0x1f7   :  { %2344 = vmatpush3.bf16.msra.mxu1 %v2341_v18  ;;  %2213 = vmatprep.mubr.msk.f32.mxu1 %vm183_vm0, %v2931_v23 }
 0x1f8   :  { %2346 = vmatprep.subr.bf16.mxu1 %v2933_v24 }
 0x1fa   :  { %2214 = vmatmul.mubr.msk.f32.vlgmr.msra.gmra.mrb[4].mxu1 %vm183_vm0, %v2939_v25 }
 0x1fb   :  { %2348 = vmatpush3.bf16.msra.mxu1 %v2933_v24 }
 0x1fc   :  { %2350 = vmatprep.subr.bf16.mxu1 %v2945_v28 }
 0x1ff   :  { %2352 = vmatpush3.bf16.msra.mxu1 %v2945_v28 }
 0x200   :  { %2366 = vmatprep.subr.bf16.mxu1 %v2341_v18 }
 0x2c9   :  { %v2190_v32 = vpop.f32.mrb[2].mxu1 }
 0x2ca   :  { %v349_v34 = vadd.f32 %v2190_v32, %v2955_v31  ;;  %v343_v35 = vpop.f32.mrb[3].mxu1  ;;  %v1558_v32 = vpop.permute.xlu1 %1557 }
 0x2cb   :  { %v344_v36 = vadd.f32 %v2955_v31, %v343_v35 }
 0x2cc   :  { %vm354_vm2 = vcmp.gt.f32.partialorder %v349_v34, 0.0  ;;  %v357_v37 = vmul.f32 %v2957_v33, %v349_v34 }
 0x2cd   :  { %vm353_vm3 = vcmp.gt.f32.partialorder %v344_v36, 0.0  ;;  %v356_v38 = vmul.f32 %v2957_v33, %v344_v36  ;;  %v2215_v39 = vpop.f32.mrb[4].mxu1 }
 0x2ce   :  { %v359_v40 = vsel %vm354_vm2, %v349_v34, %v357_v37  ;;  %v713_v41 = vpop.f32.mrb[5].mxu1  ;;  %v1561_v34 = vmul.f32 %v1558_v32, %v2901_v6  ;;  %v413_v37 = vld [vmem:[%s3269_s10 + $0x8] sm:$0xff] }
 0x2cf   :  { %v361_v42 = vsel %vm270_vm1, %v359_v40, 0.0  ;;  %v371_v43 = vmul.f32 %v359_v40, %v359_v40  ;;  %v358_v44 = vsel %vm353_vm3, %v344_v36, %v356_v38  ;;  %2224 = vmatprep.mubr.msk.f32.mxu1 %vm270_vm1, %v713_v41  ;;  %v412_v36 = vld [vmem:[%s3269_s10] sm:$0xff] }
 0x2d0   :  { %v360_v45 = vsel %vm270_vm1, %v358_v44, 0.0  ;;  %v370_v46 = vmul.f32 %v358_v44, %v358_v44  ;;  %2225 = vmatmul.mubr.msk.f32.vlgmr.msra.gmra.mrb[6].mxu1 %vm270_vm1, %v2215_v39  ;;  %v2389_v35 = vpack.c.bf16 %v1561_v34, %v1560_v30  ;;  %v2999_v38 = vpack.c.bf16 %v413_v37, %v412_v36  ;;  %v414_v39 = vld [vmem:[%s3269_s10 + $0x10] sm:$0xff]  ;;  %s2067_s10 = sld [smem:[#allocation13 + $0x1]] }
 0x2d1   :  { %v373_v47 = vsel %vm270_vm1, %v371_v43, 0.0  ;;  %v362_v48 = vadd.f32 %v361_v42, %v360_v45  ;;  %2368 = vmatpush3.bf16.msra.mxu1 %v2341_v18  ;;  %2249 = vmatprep.mubr.msk.f32.mxu1 %vm183_vm0, %v2893_v3  ;;  %v3007_v6 = vpack.c.bf16 %v415_v5, %v414_v39  ;;  %v3015_v42 = vstv %s808_s19 }
 0x2d2   :  { %v372_v49 = vsel %vm270_vm1, %v370_v46, 0.0  ;;  %2370 = vmatprep.subr.bf16.mxu1 %v2911_v13 }
 0x2d3   :  { %v363_v50 = vrot.slane %v362_v48, 4  ;;  %v374_v51 = vadd.f32 %v373_v47, %v372_v49 }
 0x2d4   :  { %2250 = vmatmul.mubr.msk.f32.vlgmr.msra.gmra.mrb[8].mxu1 %vm183_vm0, %v2919_v16 }
 0x2d5   :  { %v364_v52 = vadd.f32 %v363_v50, %v362_v48  ;;  %v375_v53 = vrot.slane %v374_v51, 4  ;;  %2372 = vmatpush3.bf16.msra.mxu1 %v2911_v13  ;;  %v2979_v13 = vld [vmem:[#allocation9 + $0x2] ss:$0 sm:$0xff] }
 0x2d6   :  { %2374 = vmatprep.subr.bf16.mxu1 %v2922_v17  ;;  %v3041_v32 = vstv %s2067_s10 }
 0x2d7   :  { %v365_v54 = vrot.slane %v364_v52, 2  ;;  %v376_v55 = vadd.f32 %v375_v53, %v374_v51 }
 0x2d9   :  { %v366_v56 = vadd.f32 %v365_v54, %v364_v52  ;;  %v377_v57 = vrot.slane %v376_v55, 2  ;;  %2376 = vmatpush3.bf16.msra.mxu1 %v2922_v17  ;;  %v2983_v17 = vstv %s2050_s28 }
 0x2da   :  { %2390 = vmatprep.subr.bf16.mxu1 %v2389_v35 }
 0x2db   :  { %v367_v58 = vrot.slane %v366_v56, 1  ;;  %v378_v59 = vadd.f32 %v377_v57, %v376_v55 }
 0x2dd   :  { %v368_v60 = vadd.f32 %v367_v58, %v366_v56  ;;  %v379_v61 = vrot.slane %v378_v59, 1 }
 0x2df   :  { %v369_v62 = vmul.f32 0.0625, %v368_v60  ;;  %v380_v63 = vadd.f32 %v379_v61, %v378_v59 }
 0x2e1   :  { %v381_v0 = vmul.f32 0.0625, %v380_v63  ;;  %v382_v1 = vmul.f32 %v369_v62, %v369_v62  ;;  %v384_v2 = vsub.f32 %v358_v44, %v369_v62  ;;  %v385_v4 = vsub.f32 %v359_v40, %v369_v62  ;;  %v3013_v40 = vld [vmem:[#allocation11] ss:$0 sm:$0xff] }
 0x2e3   :  { %v383_v7 = vsub.f32 %v381_v0, %v382_v1 }
 0x2e5   :  { %v386_v8 = vadd.f32 1e-05, %v383_v7 }
 0x2e7   :  { %2428 = vrsqrt.f32 %v386_v8 }
 0x2f1   :  { %v2429_v9 = vpop.eup %2428 }
 0x2f2   :  { %v388_v11 = vmul.f32 %v2429_v9, %v384_v2  ;;  %v389_v12 = vmul.f32 %v2429_v9, %v385_v4 }
 0x2f4   :  { %v395_v14 = vmul.f32 %v2977_v10, %v388_v11  ;;  %v396_v15 = vmul.f32 %v2977_v10, %v389_v12 }
 0x2f6   :  { %v402_v18 = vadd.f32 %v2979_v13, %v395_v14  ;;  %v403_v19 = vadd.f32 %v2979_v13, %v396_v15 }
 0x2f8   :  { %vm405_vm4 = vcmp.gt.f32.partialorder %v402_v18, 0.0  ;;  %vm406_vm5 = vcmp.gt.f32.partialorder %v403_v19, 0.0  ;;  %v408_v20 = vmul.f32 %v2983_v17, %v402_v18  ;;  %v409_v21 = vmul.f32 %v2983_v17, %v403_v19 }
 0x2fa   :  { %v410_v22 = vsel %vm405_vm4, %v402_v18, %v408_v20  ;;  %v411_v26 = vsel %vm406_vm5, %v403_v19, %v409_v21 }
 0x2fb   :  { %v2329_v27 = vpack.c.bf16 %v411_v26, %v410_v22  ;;  %v3035_v22 = vld [vmem:[#allocation11 + $0x1] ss:$0 sm:$0xff] }
 0x2fd   :  { %2330 = vmatprep.subr.bf16.mxu0 %v2329_v27 }
 0x2fe   :  { %2332 = vmatpush3.bf16.msra.mxu0 %v2329_v27 }
 0x2ff   :  { %2334 = vmatprep.subr.bf16.mxu0 %v2999_v38 }
 0x301   :  { %2196 = vmatmul.mubr.msk.f32.vlgmr.msra.gmra.mrb[0].mxu0 %vm183_vm0, %v2919_v16 }
 0x302   :  { %2336 = vmatpush3.bf16.msra.mxu0 %v2999_v38 }
 0x303   :  { %2338 = vmatprep.subr.bf16.mxu0 %v3007_v6 }
 0x306   :  { %2340 = vmatpush3.bf16.msra.mxu0 %v3007_v6 }
 0x3a3   :  { %v2226_v41 = vpop.f32.mrb[6].mxu1 }
 0x3a4   :  { %v805_v43 = vadd.f32 %v2226_v41, %v3013_v40  ;;  %v799_v44 = vpop.f32.mrb[7].mxu1 }
 0x3a5   :  { %v800_v45 = vadd.f32 %v3013_v40, %v799_v44 }
 0x3a6   :  { %vm810_vm6 = vcmp.gt.f32.partialorder %v805_v43, 0.0  ;;  %v813_v46 = vmul.f32 %v3015_v42, %v805_v43 }
 0x3a7   :  { %vm809_vm7 = vcmp.gt.f32.partialorder %v800_v45, 0.0  ;;  %v812_v47 = vmul.f32 %v3015_v42, %v800_v45  ;;  %v2251_v48 = vpop.f32.mrb[8].mxu1 }
 0x3a8   :  { %v815_v49 = vsel %vm810_vm6, %v805_v43, %v813_v46  ;;  %v1212_v50 = vpop.f32.mrb[9].mxu1  ;;  %v869_v46 = vld [vmem:[#allocation17 + $0x8] sm:$0xff] }
 0x3a9   :  { %v817_v51 = vsel %vm270_vm1, %v815_v49, 0.0  ;;  %v827_v52 = vmul.f32 %v815_v49, %v815_v49  ;;  %v814_v53 = vsel %vm809_vm7, %v800_v45, %v812_v47  ;;  %2260 = vmatprep.mubr.msk.f32.mxu1 %vm270_vm1, %v1212_v50  ;;  %v868_v45 = vld [vmem:[#allocation17] sm:$0xff] }
 0x3aa   :  { %v816_v54 = vsel %vm270_vm1, %v814_v53, 0.0  ;;  %v826_v55 = vmul.f32 %v814_v53, %v814_v53  ;;  %2261 = vmatmul.mubr.msk.f32.vlgmr.msra.gmra.mrb[10].mxu1 %vm270_vm1, %v2251_v48  ;;  %v3053_v47 = vpack.c.bf16 %v869_v46, %v868_v45  ;;  %v870_v48 = vld [vmem:[#allocation17 + $0x10] sm:$0xff]  ;;  %v3075_v45 = vstv %s2056_s23 }
 0x3ab   :  { %v829_v56 = vsel %vm270_vm1, %v827_v52, 0.0  ;;  %v818_v57 = vadd.f32 %v817_v51, %v816_v54  ;;  %2392 = vmatpush3.bf16.msra.mxu1 %v2389_v35  ;;  %2285 = vmatprep.mubr.msk.f32.mxu1 %vm183_vm0, %v2931_v23 }
 0x3ac   :  { %v828_v58 = vsel %vm270_vm1, %v826_v55, 0.0  ;;  %2394 = vmatprep.subr.bf16.mxu1 %v2933_v24 }
 0x3ad   :  { %v819_v59 = vrot.slane %v818_v57, 4  ;;  %v830_v60 = vadd.f32 %v829_v56, %v828_v58 }
 0x3ae   :  { %2286 = vmatmul.mubr.msk.f32.vlgmr.msra.gmra.mrb[12].mxu1 %vm183_vm0, %v2939_v25 }
 0x3af   :  { %v820_v61 = vadd.f32 %v819_v59, %v818_v57  ;;  %v831_v62 = vrot.slane %v830_v60, 4  ;;  %2396 = vmatpush3.bf16.msra.mxu1 %v2933_v24 }
 0x3b0   :  { %2398 = vmatprep.subr.bf16.mxu1 %v2945_v28 }
 0x3b1   :  { %v821_v63 = vrot.slane %v820_v61, 2  ;;  %v832_v0 = vadd.f32 %v831_v62, %v830_v60 }
 0x3b3   :  { %v822_v1 = vadd.f32 %v821_v63, %v820_v61  ;;  %v833_v2 = vrot.slane %v832_v0, 2  ;;  %2400 = vmatpush3.bf16.msra.mxu1 %v2945_v28  ;;  %v3037_v28 = vld [vmem:[#allocation11 + $0x2] ss:$0 sm:$0xff] }
 0x3b5   :  { %v823_v4 = vrot.slane %v822_v1, 1  ;;  %v834_v7 = vadd.f32 %v833_v2, %v832_v0 }
 0x3b7   :  { %v824_v8 = vadd.f32 %v823_v4, %v822_v1  ;;  %v835_v9 = vrot.slane %v834_v7, 1 }
 0x3b9   :  { %v825_v11 = vmul.f32 0.0625, %v824_v8  ;;  %v836_v12 = vadd.f32 %v835_v9, %v834_v7 }
 0x3bb   :  { %v837_v14 = vmul.f32 0.0625, %v836_v12  ;;  %v838_v15 = vmul.f32 %v825_v11, %v825_v11  ;;  %v840_v18 = vsub.f32 %v814_v53, %v825_v11  ;;  %v841_v19 = vsub.f32 %v815_v49, %v825_v11  ;;  %v871_v49 = vld [vmem:[#allocation17 + $0x18] sm:$0xff] }
 0x3bc   :  { %v3057_v50 = vpack.c.bf16 %v871_v49, %v870_v48 }
 0x3bd   :  { %v839_v20 = vsub.f32 %v837_v14, %v838_v15 }
 0x3bf   :  { %v842_v24 = vadd.f32 1e-05, %v839_v20 }
 0x3c1   :  { %2430 = vrsqrt.f32 %v842_v24 }
 0x3cb   :  { %v2431_v21 = vpop.eup %2430 }
 0x3cc   :  { %v844_v26 = vmul.f32 %v2431_v21, %v840_v18  ;;  %v845_v27 = vmul.f32 %v2431_v21, %v841_v19 }
 0x3ce   :  { %v851_v29 = vmul.f32 %v3035_v22, %v844_v26  ;;  %v852_v30 = vmul.f32 %v3035_v22, %v845_v27 }
 0x3d0   :  { %v858_v34 = vadd.f32 %v3037_v28, %v851_v29  ;;  %v859_v35 = vadd.f32 %v3037_v28, %v852_v30 }
 0x3d2   :  { %vm861_vm8 = vcmp.gt.f32.partialorder %v858_v34, 0.0  ;;  %vm862_vm9 = vcmp.gt.f32.partialorder %v859_v35, 0.0  ;;  %v864_v36 = vmul.f32 %v3041_v32, %v858_v34  ;;  %v865_v37 = vmul.f32 %v3041_v32, %v859_v35 }
 0x3d4   :  { %v2197_v39 = vpop.f32.mrb[0].mxu0  ;;  %v866_v5 = vsel %vm861_vm8, %v858_v34, %v864_v36  ;;  %v867_v41 = vsel %vm862_vm9, %v859_v35, %v865_v37 }
 0x3d5   :  { %v482_v43 = vpop.f32.mrb[1].mxu0  ;;  %v2353_v44 = vpack.c.bf16 %v867_v41, %v866_v5  ;;  %v3072_v41 = vld [vmem:[#allocation9 + $0x3] ss:$0 sm:$0xff] }
 0x3d6   :  { %2206 = vmatprep.mubr.msk.f32.mxu0 %vm270_vm1, %v482_v43 }
 0x3d7   :  { %2207 = vmatmul.mubr.msk.f32.vlgmr.msra.gmra.mrb[2].mxu0 %vm270_vm1, %v2197_v39  ;;  %2354 = vmatprep.subr.bf16.mxu0 %v2353_v44 }
 0x3d8   :  { %2356 = vmatpush3.bf16.msra.mxu0 %v2353_v44  ;;  %2231 = vmatprep.mubr.msk.f32.mxu0 %vm183_vm0, %v2931_v23 }
 0x3d9   :  { %2358 = vmatprep.subr.bf16.mxu0 %v3053_v47 }
 0x3db   :  { %2232 = vmatmul.mubr.msk.f32.vlgmr.msra.gmra.mrb[4].mxu0 %vm183_vm0, %v2939_v25 }
 0x3dc   :  { %2360 = vmatpush3.bf16.msra.mxu0 %v3053_v47 }
 0x3dd   :  { %2362 = vmatprep.subr.bf16.mxu0 %v3057_v50 }
 0x3e0   :  { %2364 = vmatpush3.bf16.msra.mxu0 %v3057_v50 }
 0x47d   :  { %v2262_v51 = vpop.f32.mrb[10].mxu1 }
 0x47e   :  { %v1299_v52 = vadd.f32 %v2262_v51, %v2955_v31  ;;  %v1293_v53 = vpop.f32.mrb[11].mxu1 }
 0x47f   :  { %v1294_v54 = vadd.f32 %v2955_v31, %v1293_v53 }
 0x480   :  { %vm1303_vm10 = vcmp.gt.f32.partialorder %v1299_v52, 0.0  ;;  %v1305_v55 = vmul.f32 %v1299_v52, %v2957_v33 }
 0x481   :  { %vm1302_vm11 = vcmp.gt.f32.partialorder %v1294_v54, 0.0  ;;  %v1304_v56 = vmul.f32 %v1294_v54, %v2957_v33  ;;  %v2287_v57 = vpop.f32.mrb[12].mxu1 }
 0x482   :  { %v1307_v58 = vsel %vm1303_vm10, %v1299_v52, %v1305_v55  ;;  %v1628_v59 = vpop.f32.mrb[13].mxu1 }
 0x483   :  { %v1309_v60 = vsel %vm270_vm1, %v1307_v58, 0.0  ;;  %v1319_v61 = vmul.f32 %v1307_v58, %v1307_v58  ;;  %v1306_v62 = vsel %vm1302_vm11, %v1294_v54, %v1304_v56  ;;  %2296 = vmatprep.mubr.msk.f32.mxu1 %vm270_vm1, %v1628_v59 }
 0x484   :  { %v1308_v63 = vsel %vm270_vm1, %v1306_v62, 0.0  ;;  %v1318_v0 = vmul.f32 %v1306_v62, %v1306_v62  ;;  %2297 = vmatmul.mubr.msk.f32.vlgmr.msra.gmra.mrb[14].mxu1 %vm270_vm1, %v2287_v57 }
 0x485   :  { %v1321_v31 = vsel %vm270_vm1, %v1319_v61, 0.0  ;;  %v1310_v1 = vadd.f32 %v1309_v60, %v1308_v63 }
 0x486   :  { %v1320_v2 = vsel %vm270_vm1, %v1318_v0, 0.0 }
 0x487   :  { %v1311_v33 = vrot.slane %v1310_v1, 4  ;;  %v1322_v4 = vadd.f32 %v1321_v31, %v1320_v2 }
 0x489   :  { %v1312_v7 = vadd.f32 %v1311_v33, %v1310_v1  ;;  %v1323_v8 = vrot.slane %v1322_v4, 4 }
 0x48b   :  { %v1313_v9 = vrot.slane %v1312_v7, 2  ;;  %v1324_v11 = vadd.f32 %v1323_v8, %v1322_v4 }
 0x48d   :  { %v1314_v12 = vadd.f32 %v1313_v9, %v1312_v7  ;;  %v1325_v14 = vrot.slane %v1324_v11, 2 }
 0x48f   :  { %v1315_v15 = vrot.slane %v1314_v12, 1  ;;  %v1326_v18 = vadd.f32 %v1325_v14, %v1324_v11 }
 0x491   :  { %v1316_v19 = vadd.f32 %v1315_v15, %v1314_v12  ;;  %v1327_v20 = vrot.slane %v1326_v18, 1 }
 0x493   :  { %v1317_v24 = vmul.f32 0.0625, %v1316_v19  ;;  %v1328_v21 = vadd.f32 %v1327_v20, %v1326_v18 }
 0x495   :  { %v1329_v26 = vmul.f32 0.0625, %v1328_v21  ;;  %v1330_v27 = vmul.f32 %v1317_v24, %v1317_v24  ;;  %v1332_v29 = vsub.f32 %v1306_v62, %v1317_v24  ;;  %v1333_v30 = vsub.f32 %v1307_v58, %v1317_v24 }
 0x497   :  { %v1331_v34 = vsub.f32 %v1329_v26, %v1330_v27 }
 0x499   :  { %v1334_v35 = vadd.f32 1e-05, %v1331_v34  ;;  %v3099_v34 = vld [vmem:[#allocation9 + $0x4] ss:$0 sm:$0xff] }
 0x49b   :  { %2432 = vrsqrt.f32 %v1334_v35 }
 0x4a5   :  { %v2433_v36 = vpop.eup %2432 }
 0x4a6   :  { %v1336_v37 = vmul.f32 %v2433_v36, %v1332_v29  ;;  %v1337_v39 = vmul.f32 %v2433_v36, %v1333_v30 }
 0x4a8   :  { %v1338_v5 = vmul.f32 %v2977_v10, %v1336_v37  ;;  %v1339_v43 = vmul.f32 %v2977_v10, %v1337_v39 }
 0x4aa   :  { %v2208_v44 = vpop.f32.mrb[2].mxu0  ;;  %v1340_v46 = vadd.f32 %v2979_v13, %v1338_v5  ;;  %v1341_v48 = vadd.f32 %v2979_v13, %v1339_v43  ;;  %v3105_v5 = vstv %s2059_s6 }
 0x4ab   :  { %v574_v49 = vadd.f32 %v2208_v44, %v3072_v41  ;;  %v568_v51 = vpop.f32.mrb[3].mxu0 }
 0x4ac   :  { %v569_v52 = vadd.f32 %v3072_v41, %v568_v51  ;;  %vm1342_vm12 = vcmp.gt.f32.partialorder %v1340_v46, 0.0  ;;  %vm1343_vm13 = vcmp.gt.f32.partialorder %v1341_v48, 0.0  ;;  %v1344_v53 = vmul.f32 %v1340_v46, %v2983_v17 }
 0x4ad   :  { %vm579_vm14 = vcmp.gt.f32.partialorder %v574_v49, 0.0  ;;  %v582_v54 = vmul.f32 %v3075_v45, %v574_v49  ;;  %v1345_v10 = vmul.f32 %v1341_v48, %v2983_v17 }
 0x4ae   :  { %vm578_vm15 = vcmp.gt.f32.partialorder %v569_v52, 0.0  ;;  %v581_v55 = vmul.f32 %v3075_v45, %v569_v52  ;;  %v2233_v56 = vpop.f32.mrb[4].mxu0  ;;  %v1346_v57 = vsel %vm1342_vm12, %v1340_v46, %v1344_v53 }
 0x4af   :  { %v584_v13 = vsel %vm579_vm14, %v574_v49, %v582_v54  ;;  %v938_v58 = vpop.f32.mrb[5].mxu0  ;;  %v1347_v59 = vsel %vm1343_vm13, %v1341_v48, %v1345_v10 }
 0x4b0   :  { %v586_v60 = vsel %vm270_vm1, %v584_v13, 0.0  ;;  %v596_v61 = vmul.f32 %v584_v13, %v584_v13  ;;  %v583_v62 = vsel %vm578_vm15, %v569_v52, %v581_v55  ;;  %2242 = vmatprep.mubr.msk.f32.mxu0 %vm270_vm1, %v938_v58  ;;  %v2377_v63 = vpack.c.bf16 %v1347_v59, %v1346_v57 }
 0x4b1   :  { %v585_v0 = vsel %vm270_vm1, %v583_v62, 0.0  ;;  %v595_v31 = vmul.f32 %v583_v62, %v583_v62  ;;  %2243 = vmatmul.mubr.msk.f32.vlgmr.msra.gmra.mrb[6].mxu0 %vm270_vm1, %v2233_v56 }
 0x4b2   :  { %v598_v17 = vsel %vm270_vm1, %v596_v61, 0.0  ;;  %v587_v1 = vadd.f32 %v586_v60, %v585_v0  ;;  %2378 = vmatprep.subr.bf16.mxu0 %v2377_v63  ;;  %2267 = vmatprep.mubr.msk.f32.mxu0 %vm183_vm0, %v2893_v3 }
 0x4b3   :  { %v597_v2 = vsel %vm270_vm1, %v595_v31, 0.0  ;;  %2380 = vmatpush3.bf16.msra.mxu0 %v2377_v63 }
 0x4b4   :  { %v588_v33 = vrot.slane %v587_v1, 4  ;;  %v599_v4 = vadd.f32 %v598_v17, %v597_v2  ;;  %2382 = vmatprep.subr.bf16.mxu0 %v2999_v38 }
 0x4b6   :  { %v589_v7 = vadd.f32 %v588_v33, %v587_v1  ;;  %v600_v8 = vrot.slane %v599_v4, 4  ;;  %2268 = vmatmul.mubr.msk.f32.vlgmr.msra.gmra.mrb[8].mxu0 %vm183_vm0, %v2919_v16 }
 0x4b7   :  { %2384 = vmatpush3.bf16.msra.mxu0 %v2999_v38 }
 0x4b8   :  { %v590_v9 = vrot.slane %v589_v7, 2  ;;  %v601_v11 = vadd.f32 %v600_v8, %v599_v4  ;;  %2386 = vmatprep.subr.bf16.mxu0 %v3007_v6 }
 0x4ba   :  { %v591_v12 = vadd.f32 %v590_v9, %v589_v7  ;;  %v602_v3 = vrot.slane %v601_v11, 2 }
 0x4bb   :  { %2388 = vmatpush3.bf16.msra.mxu0 %v3007_v6  ;;  %v3101_v6 = vld [vmem:[#allocation9 + $0x5] ss:$0 sm:$0xff] }
 0x4bc   :  { %v592_v14 = vrot.slane %v591_v12, 1  ;;  %v603_v15 = vadd.f32 %v602_v3, %v601_v11 }
 0x4be   :  { %v593_v18 = vadd.f32 %v592_v14, %v591_v12  ;;  %v604_v19 = vrot.slane %v603_v15, 1 }
 0x4c0   :  { %v594_v20 = vmul.f32 0.0625, %v593_v18  ;;  %v605_v24 = vadd.f32 %v604_v19, %v603_v15 }
 0x4c2   :  { %v606_v21 = vmul.f32 0.0625, %v605_v24  ;;  %v607_v26 = vmul.f32 %v594_v20, %v594_v20  ;;  %v609_v27 = vsub.f32 %v583_v62, %v594_v20  ;;  %v610_v16 = vsub.f32 %v584_v13, %v594_v20 }
 0x4c4   :  { %v608_v29 = vsub.f32 %v606_v21, %v607_v26 }
 0x4c6   :  { %v611_v38 = vadd.f32 1e-05, %v608_v29 }
 0x4c8   :  { %2434 = vrsqrt.f32 %v611_v38 }
 0x4d2   :  { %v2435_v30 = vpop.eup %2434 }
 0x4d3   :  { %v613_v35 = vmul.f32 %v2435_v30, %v609_v27  ;;  %v614_v36 = vmul.f32 %v2435_v30, %v610_v16 }
 0x4d5   :  { %v621_v37 = vmul.f32 %v3099_v34, %v614_v36  ;;  %v620_v39 = vmul.f32 %v3099_v34, %v613_v35  ;;  %v3130_v36 = vld [vmem:[#allocation11 + $0x3] ss:$0 sm:$0xff] }
 0x4d7   :  { %v628_v43 = vadd.f32 %v3101_v6, %v621_v37  ;;  %v627_v44 = vadd.f32 %v3101_v6, %v620_v39 }
 0x4d9   :  { %vm631_vm2 = vcmp.gt.f32.partialorder %v628_v43, 0.0  ;;  %v634_v46 = vmul.f32 %v3105_v5, %v628_v43  ;;  %vm630_vm3 = vcmp.gt.f32.partialorder %v627_v44, 0.0  ;;  %v633_v48 = vmul.f32 %v3105_v5, %v627_v44 }
 0x4db   :  { %v3111_v49 = vsel %vm631_vm2, %v628_v43, %v634_v46  ;;  %v3113_v51 = vsel %vm630_vm3, %v627_v44, %v633_v48  ;;  %v3133_v43 = vstv %s2073_s12 }
 0x4dc   :  { %v1096_v52 = vmul.f32 %v3111_v49, %v3111_v49  ;;  %v1095_v53 = vmul.f32 %v3113_v51, %v3113_v51 }
 0x4de   :  { %v1100_v54 = vsel %vm270_vm1, %v1096_v52, 0.0  ;;  %v1097_v10 = vsel %vm270_vm1, %v1095_v53, 0.0 }
 0x4df   :  { %1101 = vadd.xlane.f32.xlu1 %v1100_v54  ;;  %1098 = vadd.xlane.f32.xlu0 %v1097_v10 }
 0x557   :  { %v2298_v55 = vpop.f32.mrb[14].mxu1 }
 0x558   :  { %v1715_v56 = vadd.f32 %v2298_v55, %v3013_v40  ;;  %v1709_v57 = vpop.f32.mrb[15].mxu1 }
 0x559   :  { %v1710_v13 = vadd.f32 %v3013_v40, %v1709_v57 }
 0x55a   :  { %vm1719_vm4 = vcmp.gt.f32.partialorder %v1715_v56, 0.0  ;;  %v1721_v58 = vmul.f32 %v1715_v56, %v3015_v42 }
 0x55b   :  { %vm1718_vm5 = vcmp.gt.f32.partialorder %v1710_v13, 0.0  ;;  %v1720_v59 = vmul.f32 %v1710_v13, %v3015_v42 }
 0x55c   :  { %v1723_v60 = vsel %vm1719_vm4, %v1715_v56, %v1721_v58 }
 0x55d   :  { %v1725_v61 = vsel %vm270_vm1, %v1723_v60, 0.0  ;;  %v1735_v62 = vmul.f32 %v1723_v60, %v1723_v60  ;;  %v1722_v63 = vsel %vm1718_vm5, %v1710_v13, %v1720_v59  ;;  %vm2021_vm5 = vcmask 0  }
 0x55e   :  { %v1724_v0 = vsel %vm270_vm1, %v1722_v63, 0.0  ;;  %v1734_v31 = vmul.f32 %v1722_v63, %v1722_v63 }
 0x55f   :  { %v1737_v17 = vsel %vm270_vm1, %v1735_v62, 0.0  ;;  %v1726_v1 = vadd.f32 %v1725_v61, %v1724_v0 }
 0x560   :  { %v1736_v2 = vsel %vm270_vm1, %v1734_v31, 0.0 }
 0x561   :  { %v1727_v40 = vrot.slane %v1726_v1, 4  ;;  %v1738_v33 = vadd.f32 %v1737_v17, %v1736_v2 }
 0x563   :  { %v1728_v4 = vadd.f32 %v1727_v40, %v1726_v1  ;;  %v1739_v7 = vrot.slane %v1738_v33, 4 }
 0x565   :  { %v1729_v8 = vrot.slane %v1728_v4, 2  ;;  %v1740_v9 = vadd.f32 %v1739_v7, %v1738_v33 }
 0x567   :  { %v1730_v42 = vadd.f32 %v1729_v8, %v1728_v4  ;;  %v1741_v11 = vrot.slane %v1740_v9, 2 }
 0x569   :  { %v1731_v12 = vrot.slane %v1730_v42, 1  ;;  %v1742_v3 = vadd.f32 %v1741_v11, %v1740_v9 }
 0x56b   :  { %v1732_v14 = vadd.f32 %v1731_v12, %v1730_v42  ;;  %v1743_v15 = vrot.slane %v1742_v3, 1 }
 0x56d   :  { %v1733_v18 = vmul.f32 0.0625, %v1732_v14  ;;  %v1744_v19 = vadd.f32 %v1743_v15, %v1742_v3 }
 0x56f   :  { %v1745_v20 = vmul.f32 0.0625, %v1744_v19  ;;  %v1746_v24 = vmul.f32 %v1733_v18, %v1733_v18  ;;  %v1748_v21 = vsub.f32 %v1722_v63, %v1733_v18  ;;  %v1749_v26 = vsub.f32 %v1723_v60, %v1733_v18 }
 0x571   :  { %v1747_v27 = vsub.f32 %v1745_v20, %v1746_v24 }
 0x573   :  { %v1750_v16 = vadd.f32 1e-05, %v1747_v27 }
 0x575   :  { %2436 = vrsqrt.f32 %v1750_v16 }
 0x57f   :  { %v2437_v29 = vpop.eup %2436 }
 0x580   :  { %v1752_v38 = vmul.f32 %v2437_v29, %v1748_v21  ;;  %v1753_v30 = vmul.f32 %v2437_v29, %v1749_v26  ;;  %v3157_v21 = vld [vmem:[#allocation11 + $0x4] ss:$0 sm:$0xff] }
 0x582   :  { %v1754_v35 = vmul.f32 %v3035_v22, %v1752_v38  ;;  %v1755_v37 = vmul.f32 %v3035_v22, %v1753_v30  ;;  %v3163_v38 = vstv %s2076_s20 }
 0x584   :  { %v2244_v39 = vpop.f32.mrb[6].mxu0  ;;  %v1756_v44 = vadd.f32 %v3037_v28, %v1754_v35  ;;  %v1757_v46 = vadd.f32 %v3037_v28, %v1755_v37 }
 0x585   :  { %v1030_v48 = vadd.f32 %v2244_v39, %v3130_v36  ;;  %v1024_v52 = vpop.f32.mrb[7].mxu0 }
 0x586   :  { %v1025_v53 = vadd.f32 %v3130_v36, %v1024_v52  ;;  %vm1758_vm6 = vcmp.gt.f32.partialorder %v1756_v44, 0.0  ;;  %vm1759_vm7 = vcmp.gt.f32.partialorder %v1757_v46, 0.0  ;;  %v1760_v54 = vmul.f32 %v1756_v44, %v3041_v32 }
 0x587   :  { %vm1035_vm8 = vcmp.gt.f32.partialorder %v1030_v48, 0.0  ;;  %v1038_v10 = vmul.f32 %v3133_v43, %v1030_v48  ;;  %v1761_v22 = vmul.f32 %v1757_v46, %v3041_v32 }
 0x588   :  { %vm1034_vm9 = vcmp.gt.f32.partialorder %v1025_v53, 0.0  ;;  %v1037_v55 = vmul.f32 %v3133_v43, %v1025_v53  ;;  %v1762_v56 = vsel %vm1758_vm6, %v1756_v44, %v1760_v54 }
 0x589   :  { %v1040_v57 = vsel %vm1035_vm8, %v1030_v48, %v1038_v10  ;;  %v2269_v28 = vpop.f32.mrb[8].mxu0  ;;  %v1763_v13 = vsel %vm1759_vm7, %v1757_v46, %v1761_v22 }
 0x58a   :  { %v1042_v58 = vsel %vm270_vm1, %v1040_v57, 0.0  ;;  %v1052_v59 = vmul.f32 %v1040_v57, %v1040_v57  ;;  %v1039_v60 = vsel %vm1034_vm9, %v1025_v53, %v1037_v55  ;;  %v1414_v61 = vpop.f32.mrb[9].mxu0  ;;  %v2401_v62 = vpack.c.bf16 %v1763_v13, %v1762_v56 }
 0x58b   :  { %v1041_v63 = vsel %vm270_vm1, %v1039_v60, 0.0  ;;  %v1051_v0 = vmul.f32 %v1039_v60, %v1039_v60  ;;  %2278 = vmatprep.mubr.msk.f32.mxu0 %vm270_vm1, %v1414_v61 }
 0x58c   :  { %v1054_v32 = vsel %vm270_vm1, %v1052_v59, 0.0  ;;  %v1043_v31 = vadd.f32 %v1042_v58, %v1041_v63  ;;  %2279 = vmatmul.mubr.msk.f32.vlgmr.msra.gmra.mrb[10].mxu0 %vm270_vm1, %v2269_v28  ;;  %2402 = vmatprep.subr.bf16.mxu0 %v2401_v62 }
 0x58d   :  { %v1053_v17 = vsel %vm270_vm1, %v1051_v0, 0.0  ;;  %2404 = vmatpush3.bf16.msra.mxu0 %v2401_v62  ;;  %2303 = vmatprep.mubr.msk.f32.mxu0 %vm183_vm0, %v2931_v23 }
 0x58e   :  { %v1044_v1 = vrot.slane %v1043_v31, 4  ;;  %v1055_v2 = vadd.f32 %v1054_v32, %v1053_v17  ;;  %2406 = vmatprep.subr.bf16.mxu0 %v3053_v47 }
 0x590   :  { %v1045_v40 = vadd.f32 %v1044_v1, %v1043_v31  ;;  %v1056_v33 = vrot.slane %v1055_v2, 4  ;;  %2304 = vmatmul.mubr.msk.f32.vlgmr.msra.gmra.mrb[12].mxu0 %vm183_vm0, %v2939_v25 }
 0x591   :  { %2408 = vmatpush3.bf16.msra.mxu0 %v3053_v47 }
 0x592   :  { %v1046_v4 = vrot.slane %v1045_v40, 2  ;;  %v1057_v7 = vadd.f32 %v1056_v33, %v1055_v2  ;;  %2410 = vmatprep.subr.bf16.mxu0 %v3057_v50 }
 0x594   :  { %v1047_v8 = vadd.f32 %v1046_v4, %v1045_v40  ;;  %v1058_v9 = vrot.slane %v1057_v7, 2 }
 0x595   :  { %2412 = vmatpush3.bf16.msra.mxu0 %v3057_v50  ;;  %v3159_v50 = vld [vmem:[#allocation11 + $0x5] ss:$0 sm:$0xff] }
 0x596   :  { %v1048_v23 = vrot.slane %v1047_v8, 1  ;;  %v1059_v42 = vadd.f32 %v1058_v9, %v1057_v7 }
 0x598   :  { %v1049_v11 = vadd.f32 %v1048_v23, %v1047_v8  ;;  %v1060_v12 = vrot.slane %v1059_v42, 1 }
 0x59a   :  { %v1050_v3 = vmul.f32 0.0625, %v1049_v11  ;;  %v1061_v14 = vadd.f32 %v1060_v12, %v1059_v42 }
 0x59c   :  { %v1062_v15 = vmul.f32 0.0625, %v1061_v14  ;;  %v1063_v18 = vmul.f32 %v1050_v3, %v1050_v3  ;;  %v1065_v19 = vsub.f32 %v1039_v60, %v1050_v3  ;;  %v1066_v25 = vsub.f32 %v1040_v57, %v1050_v3 }
 0x59e   :  { %v1064_v20 = vsub.f32 %v1062_v15, %v1063_v18 }
 0x5a0   :  { %v1067_v47 = vadd.f32 1e-05, %v1064_v20 }
 0x5a2   :  { %2438 = vrsqrt.f32 %v1067_v47 }
 0x5ac   :  { %v2439_v24 = vpop.eup %2438 }
 0x5ad   :  { %v1069_v26 = vmul.f32 %v2439_v24, %v1065_v19  ;;  %v1070_v27 = vmul.f32 %v2439_v24, %v1066_v25 }
 0x5af   :  { %v1076_v16 = vmul.f32 %v3157_v21, %v1069_v26  ;;  %v1077_v29 = vmul.f32 %v3157_v21, %v1070_v27 }
 0x5b1   :  { %v1083_v30 = vadd.f32 %v3159_v50, %v1076_v16  ;;  %v1084_v35 = vadd.f32 %v3159_v50, %v1077_v29 }
 0x5b3   :  { %vm1086_vm0 = vcmp.gt.f32.partialorder %v1083_v30, 0.0  ;;  %v1089_v37 = vmul.f32 %v3163_v38, %v1083_v30  ;;  %vm1087_vm10 = vcmp.gt.f32.partialorder %v1084_v35, 0.0  ;;  %v1090_v39 = vmul.f32 %v3163_v38, %v1084_v35 }
 0x5b5   :  { %v3169_v44 = vsel %vm1086_vm0, %v1083_v30, %v1089_v37  ;;  %v3171_v46 = vsel %vm1087_vm10, %v1084_v35, %v1090_v39 }
 0x5b6   :  { %v1103_v48 = vmul.f32 %v3169_v44, %v3169_v44  ;;  %v1104_v52 = vmul.f32 %v3171_v46, %v3171_v46 }
 0x5b8   :  { %v1105_v53 = vsel %vm270_vm1, %v1103_v48, 0.0  ;;  %v1108_v54 = vsel %vm270_vm1, %v1104_v52, 0.0 }
 0x5b9   :  { %1106 = vadd.xlane.f32.xlu1 %v1105_v53  ;;  %1109 = vadd.xlane.f32.xlu0 %v1108_v54 }
 0x65f   :  { %v2280_v10 = vpop.f32.mrb[10].mxu0 }
 0x660   :  { %v1501_v22 = vadd.f32 %v2280_v10, %v3072_v41  ;;  %v1495_v55 = vpop.f32.mrb[11].mxu0 }
 0x661   :  { %v1496_v56 = vadd.f32 %v3072_v41, %v1495_v55 }
 0x662   :  { %vm1505_vm11 = vcmp.gt.f32.partialorder %v1501_v22, 0.0  ;;  %v1507_v57 = vmul.f32 %v1501_v22, %v3075_v45 }
 0x663   :  { %vm1504_vm12 = vcmp.gt.f32.partialorder %v1496_v56, 0.0  ;;  %v1506_v28 = vmul.f32 %v1496_v56, %v3075_v45  ;;  %v2305_v13 = vpop.f32.mrb[12].mxu0 }
 0x664   :  { %v1509_v58 = vsel %vm1505_vm11, %v1501_v22, %v1507_v57  ;;  %v1830_v59 = vpop.f32.mrb[13].mxu0 }
 0x665   :  { %v1511_v60 = vsel %vm270_vm1, %v1509_v58, 0.0  ;;  %v1521_v61 = vmul.f32 %v1509_v58, %v1509_v58  ;;  %v1508_v62 = vsel %vm1504_vm12, %v1496_v56, %v1506_v28  ;;  %2314 = vmatprep.mubr.msk.f32.mxu0 %vm270_vm1, %v1830_v59 }
 0x666   :  { %v1510_v63 = vsel %vm270_vm1, %v1508_v62, 0.0  ;;  %v1520_v0 = vmul.f32 %v1508_v62, %v1508_v62  ;;  %2315 = vmatmul.mubr.msk.f32.vlgmr.msra.gmra.mrb[14].mxu0 %vm270_vm1, %v2305_v13 }
 0x667   :  { %v1523_v41 = vsel %vm270_vm1, %v1521_v61, 0.0  ;;  %v1512_v32 = vadd.f32 %v1511_v60, %v1510_v63 }
 0x668   :  { %v1522_v31 = vsel %vm270_vm1, %v1520_v0, 0.0 }
 0x669   :  { %v1513_v45 = vrot.slane %v1512_v32, 4  ;;  %v1524_v17 = vadd.f32 %v1523_v41, %v1522_v31 }
 0x66b   :  { %v1514_v1 = vadd.f32 %v1513_v45, %v1512_v32  ;;  %v1525_v2 = vrot.slane %v1524_v17, 4 }
 0x66d   :  { %v1515_v40 = vrot.slane %v1514_v1, 2  ;;  %v1526_v33 = vadd.f32 %v1525_v2, %v1524_v17 }
 0x66f   :  { %v1516_v4 = vadd.f32 %v1515_v40, %v1514_v1  ;;  %v1527_v7 = vrot.slane %v1526_v33, 2 }
 0x671   :  { %v1517_v8 = vrot.slane %v1516_v4, 1  ;;  %v1528_v9 = vadd.f32 %v1527_v7, %v1526_v33 }
 0x673   :  { %v1518_v23 = vadd.f32 %v1517_v8, %v1516_v4  ;;  %v1529_v42 = vrot.slane %v1528_v9, 1 }
 0x675   :  { %v1519_v11 = vmul.f32 0.0625, %v1518_v23  ;;  %v1530_v12 = vadd.f32 %v1529_v42, %v1528_v9 }
 0x677   :  { %v1531_v3 = vmul.f32 0.0625, %v1530_v12  ;;  %v1532_v14 = vmul.f32 %v1519_v11, %v1519_v11  ;;  %v1534_v15 = vsub.f32 %v1508_v62, %v1519_v11  ;;  %v1535_v18 = vsub.f32 %v1509_v58, %v1519_v11 }
 0x679   :  { %v1533_v19 = vsub.f32 %v1531_v3, %v1532_v14 }
 0x67b   :  { %v1536_v25 = vadd.f32 1e-05, %v1533_v19 }
 0x67d   :  { %2440 = vrsqrt.f32 %v1536_v25 }
 0x687   :  { %v2441_v20 = vpop.eup %2440 }
 0x688   :  { %v1538_v47 = vmul.f32 %v2441_v20, %v1534_v15  ;;  %v1539_v24 = vmul.f32 %v2441_v20, %v1535_v18 }
 0x68a   :  { %v1540_v26 = vmul.f32 %v3099_v34, %v1538_v47  ;;  %v1541_v27 = vmul.f32 %v3099_v34, %v1539_v24 }
 0x68c   :  { %v1542_v16 = vadd.f32 %v3101_v6, %v1540_v26  ;;  %v1543_v29 = vadd.f32 %v3101_v6, %v1541_v27 }
 0x68e   :  { %vm1544_vm13 = vcmp.gt.f32.partialorder %v1542_v16, 0.0  ;;  %v1546_v30 = vmul.f32 %v1542_v16, %v3105_v5  ;;  %vm1545_vm14 = vcmp.gt.f32.partialorder %v1543_v29, 0.0  ;;  %v1547_v35 = vmul.f32 %v1543_v29, %v3105_v5 }
 0x690   :  { %v3195_v37 = vsel %vm1544_vm13, %v1542_v16, %v1546_v30  ;;  %v3197_v39 = vsel %vm1545_vm14, %v1543_v29, %v1547_v35 }
 0x691   :  { %v1968_v48 = vmul.f32 %v3195_v37, %v3195_v37  ;;  %v1969_v34 = vmul.f32 %v3197_v39, %v3197_v39 }
 0x693   :  { %v1970_v52 = vsel %vm270_vm1, %v1968_v48, 0.0  ;;  %v1973_v6 = vsel %vm270_vm1, %v1969_v34, 0.0 }
 0x694   :  { %1971 = vadd.xlane.f32.xlu0 %v1970_v52 }
 0x698   :  { %1974 = vadd.xlane.f32.xlu0 %v1973_v6 }
 0x739   :  { %v2316_v53 = vpop.f32.mrb[14].mxu0 }
 0x73a   :  { %v1917_v54 = vadd.f32 %v2316_v53, %v3130_v36  ;;  %v1911_v5 = vpop.f32.mrb[15].mxu0 }
 0x73b   :  { %v1912_v10 = vadd.f32 %v3130_v36, %v1911_v5 }
 0x73c   :  { %vm1921_vm15 = vcmp.gt.f32.partialorder %v1917_v54, 0.0  ;;  %v1923_v22 = vmul.f32 %v1917_v54, %v3133_v43 }
 0x73d   :  { %vm1920_vm2 = vcmp.gt.f32.partialorder %v1912_v10, 0.0  ;;  %v1922_v55 = vmul.f32 %v1912_v10, %v3133_v43 }
 0x73e   :  { %v1925_v56 = vsel %vm1921_vm15, %v1917_v54, %v1923_v22 }
 0x73f   :  { %v1927_v57 = vsel %vm270_vm1, %v1925_v56, 0.0  ;;  %v1937_v28 = vmul.f32 %v1925_v56, %v1925_v56  ;;  %v1924_v13 = vsel %vm1920_vm2, %v1912_v10, %v1922_v55 }
 0x740   :  { %v1926_v58 = vsel %vm270_vm1, %v1924_v13, 0.0  ;;  %v1936_v59 = vmul.f32 %v1924_v13, %v1924_v13 }
 0x741   :  { %v1939_v60 = vsel %vm270_vm1, %v1937_v28, 0.0  ;;  %v1928_v61 = vadd.f32 %v1927_v57, %v1926_v58 }
 0x742   :  { %v1938_v62 = vsel %vm270_vm1, %v1936_v59, 0.0 }
 0x743   :  { %v1929_v36 = vrot.slane %v1928_v61, 4  ;;  %v1940_v63 = vadd.f32 %v1939_v60, %v1938_v62 }
 0x745   :  { %v1930_v0 = vadd.f32 %v1929_v36, %v1928_v61  ;;  %v1941_v41 = vrot.slane %v1940_v63, 4 }
 0x747   :  { %v1931_v32 = vrot.slane %v1930_v0, 2  ;;  %v1942_v31 = vadd.f32 %v1941_v41, %v1940_v63  ;;  %v2460_v41 = vld [vmem:[%s3262_s3] sm:$0xff] }
 0x749   :  { %v1932_v43 = vadd.f32 %v1931_v32, %v1930_v0  ;;  %v1943_v45 = vrot.slane %v1942_v31, 2  ;;  %v1093_v32 = vsub.f32 1.0, %v2460_v41 }
 0x74b   :  { %v1933_v17 = vrot.slane %v1932_v43, 1  ;;  %v1944_v1 = vadd.f32 %v1943_v45, %v1942_v31  ;;  %v2461_v31 = vld [vmem:[%s3262_s3 + $0x8] sm:$0xff] }
 0x74d   :  { %v1934_v2 = vadd.f32 %v1933_v17, %v1932_v43  ;;  %v1945_v40 = vrot.slane %v1944_v1, 1  ;;  %v1094_v43 = vsub.f32 1.0, %v2461_v31 }
 0x74f   :  { %v1935_v33 = vmul.f32 0.0625, %v1934_v2  ;;  %v1946_v4 = vadd.f32 %v1945_v40, %v1944_v1 }
 0x751   :  { %v1947_v7 = vmul.f32 0.0625, %v1946_v4  ;;  %v1948_v8 = vmul.f32 %v1935_v33, %v1935_v33  ;;  %v1950_v9 = vsub.f32 %v1924_v13, %v1935_v33  ;;  %v1951_v23 = vsub.f32 %v1925_v56, %v1935_v33 }
 0x753   :  { %v1949_v42 = vsub.f32 %v1947_v7, %v1948_v8 }
 0x755   :  { %v1952_v11 = vadd.f32 1e-05, %v1949_v42 }
 0x757   :  { %2442 = vrsqrt.f32 %v1952_v11 }
 0x761   :  { %v2443_v12 = vpop.eup %2442 }
 0x762   :  { %v1954_v3 = vmul.f32 %v2443_v12, %v1950_v9  ;;  %v1955_v14 = vmul.f32 %v2443_v12, %v1951_v23 }
 0x764   :  { %v1956_v15 = vmul.f32 %v3157_v21, %v1954_v3  ;;  %v1957_v18 = vmul.f32 %v3157_v21, %v1955_v14  ;;  %v1111_v21 = vmul.f32 %v3169_v44, %v3113_v51  ;;  %v1099_v51 = vpop.xlane.xlu0 %1098 }
 0x765   :  { %v1119_v5 = vmax.f32 %v1099_v51, 1e-24 }
 0x766   :  { %v1958_v19 = vadd.f32 %v3159_v50, %v1956_v15  ;;  %v1959_v25 = vadd.f32 %v3159_v50, %v1957_v18  ;;  %v1112_v50 = vmul.f32 %v3171_v46, %v3111_v49  ;;  %v1113_v35 = vsel %vm270_vm1, %v1111_v21, 0.0  ;;  %v1102_v49 = vpop.xlane.xlu1 %1101  ;;  %v2462_v15 = vld [vmem:[%s3263_s4] sm:$0xff] }
 0x767   :  { %v1120_v53 = vmax.f32 %v1102_v49, 1e-24  ;;  %v1966_v18 = vsub.f32 1.0, %v2462_v15 }
 0x768   :  { %vm1960_vm3 = vcmp.gt.f32.partialorder %v1958_v19, 0.0  ;;  %v1962_v20 = vmul.f32 %v1958_v19, %v3163_v38  ;;  %vm1961_vm4 = vcmp.gt.f32.partialorder %v1959_v25, 0.0  ;;  %v1963_v47 = vmul.f32 %v1959_v25, %v3163_v38  ;;  %v1110_v44 = vpop.xlane.xlu0 %1109 }
 0x769   :  { %v1116_v38 = vsel %vm270_vm1, %v1112_v50, 0.0  ;;  %v1126_v22 = vmax.f32 %v1110_v44, 1e-24  ;;  %2444 = vrsqrt.f32 %v1120_v53 }
 0x76a   :  { %v1964_v24 = vsel %vm1960_vm3, %v1958_v19, %v1962_v20  ;;  %v1965_v26 = vsel %vm1961_vm4, %v1959_v25, %v1963_v47  ;;  %v1107_v46 = vpop.xlane.xlu1 %1106  ;;  %2446 = vrsqrt.f32 %v1119_v5  ;;  %v2463_v20 = vld [vmem:[%s3263_s4 + $0x8] sm:$0xff]  ;;  %s2686_s4 = smov [#allocation18]  }
 0x76b   :  { %v1976_v27 = vmul.f32 %v1964_v24, %v1964_v24  ;;  %v1977_v16 = vmul.f32 %v1965_v26, %v1965_v26  ;;  %v1984_v48 = vmul.f32 %v1964_v24, %v3195_v37  ;;  %v1985_v52 = vmul.f32 %v1965_v26, %v3197_v39  ;;  %s2029_s30 = sshll.u32 %s2686_s4, 4  ;;  %s2030_s30 = int_to_ptr.vmem [resolvable:$true] %s2029_s30 }
 0x76c   :  { %v1972_v54 = vpop.xlane.xlu0 %1971  ;;  %v1125_v10 = vmax.f32 %v1107_v46, 1e-24  ;;  %v1967_v47 = vsub.f32 1.0, %v2463_v20  ;;  %s2638_s9 = scalar_lea.vmem %s2030_s30, 16  ;;  %s2642_s5 = scalar_lea.vmem %s2030_s30, 32 }
 0x76d   :  { %v1978_v29 = vsel %vm270_vm1, %v1976_v27, 0.0  ;;  %v1981_v30 = vsel %vm270_vm1, %v1977_v16, 0.0  ;;  %v1986_v34 = vsel %vm270_vm1, %v1984_v48, 0.0  ;;  %v1989_v6 = vsel %vm270_vm1, %v1985_v52, 0.0  ;;  %p2639_p6 = scmp.ne.s32.totalorder %s2030_s30, %s2638_s9  ;;  %p2643_p7 = scmp.lt.s32.totalorder %s2030_s30, %s2030_s30 }
 0x76e   :  { %1979 = vadd.xlane.f32.xlu1 %v1978_v29  ;;  %1982 = vadd.xlane.f32.xlu0 %v1981_v30  ;;  %2448 = vrsqrt.f32 %v1125_v10  ;;  %v1992_v39 = vmax.f32 %v1972_v54, 1e-24  ;;  %vm1135_vm1 = vcmask 7168   ;;  %p2644_p8 = scmp.lt.s32.totalorder %s2642_s5, %s2638_s9 }
 0x76f   :  { %2450 = vrsqrt.f32 %v1126_v22 }
 0x770   :  { %v1975_v37 = vpop.xlane.xlu0 %1974  ;;  %2452 = vrsqrt.f32 %v1992_v39  ;;  %p2645_p9 = por %p2644_p8, %p2643_p7 }
 0x771   :  { %v1993_v55 = vmax.f32 %v1975_v37, 1e-24 }
 0x772   :  { %1114 = vadd.xlane.f32.xlu1 %v1113_v35  ;;  %1117 = vadd.xlane.f32.xlu0 %v1116_v38  ;;  %p2646_p10 = pnand %p2645_p9, %p2639_p6 }
 0x773   :  { %2454 = vrsqrt.f32 %v1993_v55  ;;  %v2445_v58 = vpop.eup %2444 }
 0x774   :  { %v2447_v59 = vpop.eup %2446 }
 0x776   :  { %1987 = vadd.xlane.f32.xlu1 %v1986_v34  ;;  %1990 = vadd.xlane.f32.xlu0 %v1989_v6 }
 0x778   :  { %v2449_v62 = vpop.eup %2448 }
 0x779   :  { %v2451_v0 = vpop.eup %2450 }
 0x77a   :  { %v2453_v4 = vpop.eup %2452 }
 0x77d   :  { %v2455_v9 = vpop.eup %2454 }
 0x7fb   :  { %v1980_v56 = vpop.xlane.xlu1 %1979  ;;  %v1983_v57 = vpop.xlane.xlu0 %1982 }
 0x7fc   :  { %v1998_v28 = vmax.f32 %v1980_v56, 1e-24  ;;  %v1999_v13 = vmax.f32 %v1983_v57, 1e-24 }
 0x7fe   :  { %2456 = vrsqrt.f32 %v1998_v28 }
 0x7ff   :  { %2458 = vrsqrt.f32 %v1999_v13  ;;  %v1115_v60 = vpop.xlane.xlu1 %1114  ;;  %v1118_v61 = vpop.xlane.xlu0 %1117 }
 0x800   :  { %v1123_v36 = vmul.f32 %v2447_v59, %v1115_v60  ;;  %v1124_v63 = vmul.f32 %v2445_v58, %v1118_v61 }
 0x802   :  { %v1129_v45 = vmul.f32 %v2449_v62, %v1123_v36  ;;  %v1130_v17 = vmul.f32 %v2451_v0, %v1124_v63 }
 0x803   :  { %v1988_v40 = vpop.xlane.xlu1 %1987  ;;  %v1991_v33 = vpop.xlane.xlu0 %1990 }
 0x804   :  { %v1131_v1 = vsub.f32 1.0, %v1129_v45  ;;  %v1132_v2 = vsub.f32 1.0, %v1130_v17  ;;  %v1996_v23 = vmul.f32 %v2453_v4, %v1988_v40  ;;  %v1997_v3 = vmul.f32 %v2455_v9, %v1991_v33 }
 0x806   :  { %v1133_v7 = vmul.f32 %v1131_v1, %v1093_v32  ;;  %v1134_v8 = vmul.f32 %v1132_v2, %v1094_v43 }
 0x808   :  { %v2457_v42 = vpop.eup %2456  ;;  %v1136_v11 = vsel %vm1135_vm1, %v1133_v7, 0.0  ;;  %v1137_v12 = vsel %vm1135_vm1, %v1134_v8, 0.0 }
 0x809   :  { %v2459_v14 = vpop.eup %2458  ;;  %v1138_v19 = vadd.f32 %v1137_v12, %v1136_v11  ;;  %v2002_v25 = vmul.f32 %v2457_v42, %v1996_v23 }
 0x80a   :  { %v2003_v24 = vmul.f32 %v2459_v14, %v1997_v3 }
 0x80b   :  { %v1139_v26 = vrot.slane %v1138_v19, 4  ;;  %v2004_v27 = vsub.f32 1.0, %v2002_v25 }
 0x80c   :  { %v2005_v16 = vsub.f32 1.0, %v2003_v24 }
 0x80d   :  { %v2006_v29 = vmul.f32 %v2004_v27, %v1966_v18  ;;  %v1140_v30 = vadd.f32 %v1139_v26, %v1138_v19 }
 0x80e   :  { %v2007_v21 = vmul.f32 %v2005_v16, %v1967_v47 }
 0x80f   :  { %v2008_v50 = vsel %vm1135_vm1, %v2006_v29, 0.0  ;;  %v1141_v35 = vrot.slane %v1140_v30, 2 }
 0x810   :  { %v2009_v38 = vsel %vm1135_vm1, %v2007_v21, 0.0 }
 0x811   :  { %v2010_v48 = vadd.f32 %v2009_v38, %v2008_v50  ;;  %v1142_v52 = vadd.f32 %v1141_v35, %v1140_v30 }
 0x813   :  { %v2011_v34 = vrot.slane %v2010_v48, 4  ;;  %v1143_v6 = vrot.slane %v1142_v52, 1 }
 0x815   :  { %v2012_v51 = vadd.f32 %v2011_v34, %v2010_v48  ;;  %v1144_v44 = vadd.f32 %v1143_v6, %v1142_v52 }
 0x817   :  { %v2013_v49 = vrot.slane %v2012_v51, 2  ;;  %v1145_v54 = vmul.f32 0.125, %v1144_v44 }
 0x819   :  { %v2014_v46 = vadd.f32 %v2013_v49, %v2012_v51  ;;  %v2018_v22 = vmul.f32 0.6, %v1145_v54 }
 0x81b   :  { %v2015_v53 = vrot.slane %v2014_v46, 1 }
 0x81d   :  { %v2016_v5 = vadd.f32 %v2015_v53, %v2014_v46 }
 0x81f   :  { %v2017_v10 = vmul.f32 0.25, %v2016_v5 }
 0x821   :  { %v2019_v37 = vmul.f32 0.4, %v2017_v10 }
 0x823   :  { %v2020_v39 = vadd.f32 %v2019_v37, %v2018_v22 }
 0x825   :  { %2022 = vst.msk [vmem:[#allocation18] sm:$0x1] %vm2021_vm5, %v2020_v39 }
 0x826   :  { %2649 = shalt.err (!%p2646_p10)
}
 0x827   :  { %s2650_s29 = scalar_lea.hbm %s3272_s13, 16 }
 0x828   :  { %p2651_p11 = scmp.ne.s32.totalorder %s3272_s13, %s2650_s29  ;;  %p2654_p12 = scmp.lt.u32.totalorder %s2650_s29, %s3272_s13 }
 0x82a   :  { %p2656_p13 = pnand %p2654_p12, %p2651_p11 }
 0x82c   :  { %2659 = shalt.err (!%p2656_p13)
}
 0x82d   :  { %2032 = dma.vmem_to_hbm [thread:$0]  %s2030_s30, 16, %s3272_s13, [#allocation4]  }
 0x82e   :  { %2672 = dma.done.wait [#allocation4], 16  }
 0x82f   :  { %2673 = vsyncadd [#allocation4], 4294967280 }
 0x830   :  { %2036 = vsyncpa [#allocation3], 1 }
 0x831   :  { %2037 = vsyncpa [#allocation7], 1 }
 0x832   :  { %2038 = vsyncpa [#allocation10], 1 }
 0x833   :  { %2039 = vsyncpa [#allocation16], 1 }
 0x834   :  { %2040 = vsyncpa [#allocation4], 1 }
 0x835   :  { %2041 = vsyncpa [#allocation5], 1 }
 0x836   :  { %2042 = vsyncpa [#allocation14], 1 }

</bundles_post_ra>
